<compile_context>
chip_gen: v7x
topology: tpu7x:2x2x1
jax: 0.10.0
libtpu: 0.0.40
codegen_flags: <defaults>
</compile_context>

<pallas_src>
import functools

import jax
import jax.numpy as jnp
from jax.experimental import pallas as pl
from jax.experimental.pallas import tpu as pltpu

IN_DIM = 6144
HID = 100
HID_PAD = 128     # 100 padded to a full lane width
OUT_PAD = 128     # 1 padded to a full lane width (sliced back to 1 in wrapper)


def mlp_kernel(x_ref, w1_ref, b1_ref, w2_ref, b2_ref, w3_ref, b3_ref,
               w4_ref, b4_ref, o_ref):
    # fc1 + ReLU  (bf16 x bf16 MXU matmul, f32 accumulation; bias/act in f32)
    h = jnp.dot(x_ref[...], w1_ref[...], preferred_element_type=jnp.float32)
    h = jnp.maximum(h + b1_ref[...], 0.0)
    # fc2 + ReLU
    h = jnp.dot(h.astype(jnp.bfloat16), w2_ref[...],
                preferred_element_type=jnp.float32)
    h = jnp.maximum(h + b2_ref[...], 0.0)
    # fc3 + ReLU
    h = jnp.dot(h.astype(jnp.bfloat16), w3_ref[...],
                preferred_element_type=jnp.float32)
    h = jnp.maximum(h + b3_ref[...], 0.0)
    # out + sigmoid (only lane 0 is meaningful; padded lanes give sigmoid(0)
    # and are discarded by the wrapper slice). Output stays 128-lane-dense so
    # the store is an unmasked vst.
    z = jnp.dot(h.astype(jnp.bfloat16), w4_ref[...],
                preferred_element_type=jnp.float32)
    o_ref[...] = jax.nn.sigmoid(z + b4_ref[...])


def _pad_cols(w, new_cols):
    in_dim, out_dim = w.shape
    if out_dim == new_cols:
        return w
    return jnp.concatenate(
        [w, jnp.zeros((in_dim, new_cols - out_dim), w.dtype)], axis=1)


def _pad_rows(w, new_rows):
    in_dim, out_dim = w.shape
    if in_dim == new_rows:
        return w
    return jnp.concatenate(
        [w, jnp.zeros((new_rows - in_dim, out_dim), w.dtype)], axis=0)


def _pad_vec(b, new_len):
    if b.shape[0] == new_len:
        return b
    return jnp.concatenate([b, jnp.zeros((new_len - b.shape[0],), b.dtype)])


def _round_up(n, m):
    return ((n + m - 1) // m) * m


def prepare_params(params):
    """Pad hidden/output dims to 128 lanes and cast weights to bf16.

    Call ONCE outside the hot path; the result is what net_forward consumes.
    Weights are stored as (in, out) so the kernel computes x @ W.
    """
    w1, b1, w2, b2, w3, b3, w4, b4 = params
    w1p = _pad_cols(w1, HID_PAD).astype(jnp.bfloat16)                      # (6144, 128)
    b1p = _pad_vec(b1, HID_PAD).reshape(1, HID_PAD).astype(jnp.float32)
    w2p = _pad_cols(_pad_rows(w2, HID_PAD), HID_PAD).astype(jnp.bfloat16)  # (128, 128)
    b2p = _pad_vec(b2, HID_PAD).reshape(1, HID_PAD).astype(jnp.float32)
    w3p = _pad_cols(_pad_rows(w3, HID_PAD), HID_PAD).astype(jnp.bfloat16)  # (128, 128)
    b3p = _pad_vec(b3, HID_PAD).reshape(1, HID_PAD).astype(jnp.float32)
    w4p = _pad_cols(_pad_rows(w4, HID_PAD), OUT_PAD).astype(jnp.bfloat16)  # (128, 128)
    b4p = _pad_vec(b4, OUT_PAD).reshape(1, OUT_PAD).astype(jnp.float32)
    return (w1p, b1p, w2p, b2p, w3p, b3p, w4p, b4p)


def _mlp_pallas(x_pad_bf16, padded_params, tile):
    """x_pad_bf16: (B_pad, 6144) bf16 with B_pad % tile == 0."""
    w1p, b1p, w2p, b2p, w3p, b3p, w4p, b4p = padded_params
    B_pad = x_pad_bf16.shape[0]
    grid = (B_pad // tile,)

    def x_map(i):
        return (i, 0)

    def const_map(i):
        return (0, 0)

    return pl.pallas_call(
        mlp_kernel,
        out_shape=jax.ShapeDtypeStruct((B_pad, OUT_PAD), jnp.float32),
        grid_spec=pltpu.PrefetchScalarGridSpec(
            num_scalar_prefetch=0,
            grid=grid,
            in_specs=[
                pl.BlockSpec((tile, IN_DIM), x_map),             # x   (bf16)
                pl.BlockSpec((IN_DIM, HID_PAD), const_map),      # w1  (bf16)
                pl.BlockSpec((1, HID_PAD), const_map),           # b1  (f32)
                pl.BlockSpec((HID_PAD, HID_PAD), const_map),     # w2  (bf16)
                pl.BlockSpec((1, HID_PAD), const_map),           # b2  (f32)
                pl.BlockSpec((HID_PAD, HID_PAD), const_map),     # w3  (bf16)
                pl.BlockSpec((1, HID_PAD), const_map),           # b3  (f32)
                pl.BlockSpec((HID_PAD, OUT_PAD), const_map),     # w4  (bf16)
                pl.BlockSpec((1, OUT_PAD), const_map),           # b4  (f32)
            ],
            out_specs=pl.BlockSpec((tile, OUT_PAD), x_map),
        ),
        compiler_params=pltpu.CompilerParams(
            dimension_semantics=("parallel",),
            vmem_limit_bytes=48 * 1024 * 1024,
        ),
    )(x_pad_bf16, w1p, b1p, w2p, b2p, w3p, b3p, w4p, b4p)


@functools.partial(jax.jit, static_argnames=("batch_tile",))
def net_forward(x, padded_params, *, batch_tile=256):
    """x: (B, 6144) float32.  padded_params: output of prepare_params.

    Returns (B, 1) float32. The batch is zero-padded internally to a multiple
    of the (possibly shrunk) batch tile, so any B works.
    """
    B = x.shape[0]
    tile = min(batch_tile, _round_up(B, 8))   # small batches: one small tile
    B_pad = _round_up(B, tile)

    xb = x.astype(jnp.bfloat16)
    if B_pad != B:
        xb = jnp.concatenate(
            [xb, jnp.zeros((B_pad - B, IN_DIM), jnp.bfloat16)], axis=0)

    out_padded = _mlp_pallas(xb, padded_params, tile)
    return out_padded[:B, :1]


def init_params(key):
    """Deterministic init mimicking PyTorch nn.Linear default
    (uniform in [-1/sqrt(fan_in), 1/sqrt(fan_in)]).
    Weights are stored transposed as (in, out) so the kernel computes x @ W."""
    dims = [(IN_DIM, HID), (HID, HID), (HID, HID), (HID, 1)]
    params = []
    for (fan_in, fan_out) in dims:
        key, kw, kb = jax.random.split(key, 3)
        bound = 1.0 / jnp.sqrt(float(fan_in))
        w = jax.random.uniform(kw, (fan_in, fan_out), jnp.float32, -bound, bound)
        b = jax.random.uniform(kb, (fan_out,), jnp.float32, -bound, bound)
        params += [w, b]
    return tuple(params)


def reference_forward(x, params):
    """Pure-JAX f32 reference for correctness check."""
    w1, b1, w2, b2, w3, b3, w4, b4 = params
    h = jnp.maximum(x @ w1 + b1, 0.0)
    h = jnp.maximum(h @ w2 + b2, 0.0)
    h = jnp.maximum(h @ w3 + b3, 0.0)
    return jax.nn.sigmoid(h @ w4 + b4)


if __name__ == "__main__":
    key = jax.random.PRNGKey(0)
    kx, kp = jax.random.split(key)

    params = init_params(kp)
    padded_params = prepare_params(params)   # pad + bf16-cast once

    # Small batch: exercises batch padding (tile shrinks to 16, single step).
    x_small = jax.random.normal(kx, (16, IN_DIM), jnp.float32)
    out_small = jax.block_until_ready(net_forward(x_small, padded_params))
    ref_small = reference_forward(x_small, params)
    assert out_small.shape == (16, 1)
    err_small = float(jnp.max(jnp.abs(out_small - ref_small)))
    assert err_small < 2e-2, f"max err {err_small}"  # bf16 matmul inputs

    # Larger batch: exercises the 256-row tile and a 2-step parallel grid.
    x_big = jax.random.normal(kx, (512, IN_DIM), jnp.float32)
    out_big = jax.block_until_ready(net_forward(x_big, padded_params))
    ref_big = reference_forward(x_big, params)
    assert out_big.shape == (512, 1)
    err_big = float(jnp.max(jnp.abs(out_big - ref_big)))
    assert err_big < 2e-2, f"max err {err_big}"

    print("KERNEL_OK")
</pallas_src>

<mosaic_0001>
module attributes {stable_mosaic.version = 11 : i64} {
  func.func @mlp_kernel(%arg0: i32, %arg1: memref<16x6144xbf16, #tpu.memory_space<vmem>>, %arg2: memref<6144x128xbf16, #tpu.memory_space<vmem>>, %arg3: memref<1x128xf32, #tpu.memory_space<vmem>>, %arg4: memref<128x128xbf16, #tpu.memory_space<vmem>>, %arg5: memref<1x128xf32, #tpu.memory_space<vmem>>, %arg6: memref<128x128xbf16, #tpu.memory_space<vmem>>, %arg7: memref<1x128xf32, #tpu.memory_space<vmem>>, %arg8: memref<128x128xbf16, #tpu.memory_space<vmem>>, %arg9: memref<1x128xf32, #tpu.memory_space<vmem>>, %arg10: memref<16x128xf32, #tpu.memory_space<vmem>>) attributes {dimension_semantics = [#tpu.dimension_semantics<parallel>], iteration_bounds = array<i64: 1>, scalar_prefetch = 0 : i64, scratch_operands = 0 : i64, tpu.core_type = #tpu.core_type<tc>, window_params = [{transform_indices = @transform_0, window_bounds = array<i64: 16, 6144>}, {pipeline_mode = #tpu.pipeline_mode<synchronous>, transform_indices = @transform_1, window_bounds = array<i64: 6144, 128>}, {pipeline_mode = #tpu.pipeline_mode<synchronous>, transform_indices = @transform_2, window_bounds = array<i64: 1, 128>}, {pipeline_mode = #tpu.pipeline_mode<synchronous>, transform_indices = @transform_3, window_bounds = array<i64: 128, 128>}, {pipeline_mode = #tpu.pipeline_mode<synchronous>, transform_indices = @transform_4, window_bounds = array<i64: 1, 128>}, {pipeline_mode = #tpu.pipeline_mode<synchronous>, transform_indices = @transform_5, window_bounds = array<i64: 128, 128>}, {pipeline_mode = #tpu.pipeline_mode<synchronous>, transform_indices = @transform_6, window_bounds = array<i64: 1, 128>}, {pipeline_mode = #tpu.pipeline_mode<synchronous>, transform_indices = @transform_7, window_bounds = array<i64: 128, 128>}, {pipeline_mode = #tpu.pipeline_mode<synchronous>, transform_indices = @transform_8, window_bounds = array<i64: 1, 128>}, {transform_indices = @transform_9, window_bounds = array<i64: 16, 128>}]} {
    %c0 = arith.constant 0 : index
    %c0_0 = arith.constant 0 : index
    %0 = vector.load %arg1[%c0, %c0_0] : memref<16x6144xbf16, #tpu.memory_space<vmem>>, vector<16x6144xbf16>
    %c0_1 = arith.constant 0 : index
    %c0_2 = arith.constant 0 : index
    %1 = vector.load %arg2[%c0_1, %c0_2] : memref<6144x128xbf16, #tpu.memory_space<vmem>>, vector<6144x128xbf16>
    %cst = arith.constant dense<0.000000e+00> : vector<16x128xf32>
    %2 = tpu.matmul %0, %1, %cst {dimension_numbers = #tpu.dot_dimension_numbers<[1], [0], [0], [1], [0, 0, 1, 1], [], []>} : vector<16x6144xbf16>, vector<6144x128xbf16>, vector<16x128xf32> -> vector<16x128xf32>
    %c0_3 = arith.constant 0 : index
    %c0_4 = arith.constant 0 : index
    %3 = vector.load %arg3[%c0_3, %c0_4] : memref<1x128xf32, #tpu.memory_space<vmem>>, vector<1x128xf32>
    %4 = vector.broadcast %3 : vector<1x128xf32> to vector<16x128xf32>
    %5 = arith.addf %2, %4 : vector<16x128xf32>
    %cst_5 = arith.constant 0.000000e+00 : f32
    %6 = vector.broadcast %cst_5 : f32 to vector<16x128xf32>
    %7 = arith.maximumf %5, %6 : vector<16x128xf32>
    %8 = arith.truncf %7 : vector<16x128xf32> to vector<16x128xbf16>
    %c0_6 = arith.constant 0 : index
    %c0_7 = arith.constant 0 : index
    %9 = vector.load %arg4[%c0_6, %c0_7] : memref<128x128xbf16, #tpu.memory_space<vmem>>, vector<128x128xbf16>
    %cst_8 = arith.constant dense<0.000000e+00> : vector<16x128xf32>
    %10 = tpu.matmul %8, %9, %cst_8 {dimension_numbers = #tpu.dot_dimension_numbers<[1], [0], [0], [1], [0, 0, 1, 1], [], []>} : vector<16x128xbf16>, vector<128x128xbf16>, vector<16x128xf32> -> vector<16x128xf32>
    %c0_9 = arith.constant 0 : index
    %c0_10 = arith.constant 0 : index
    %11 = vector.load %arg5[%c0_9, %c0_10] : memref<1x128xf32, #tpu.memory_space<vmem>>, vector<1x128xf32>
    %12 = vector.broadcast %11 : vector<1x128xf32> to vector<16x128xf32>
    %13 = arith.addf %10, %12 : vector<16x128xf32>
    %cst_11 = arith.constant 0.000000e+00 : f32
    %14 = vector.broadcast %cst_11 : f32 to vector<16x128xf32>
    %15 = arith.maximumf %13, %14 : vector<16x128xf32>
    %16 = arith.truncf %15 : vector<16x128xf32> to vector<16x128xbf16>
    %c0_12 = arith.constant 0 : index
    %c0_13 = arith.constant 0 : index
    %17 = vector.load %arg6[%c0_12, %c0_13] : memref<128x128xbf16, #tpu.memory_space<vmem>>, vector<128x128xbf16>
    %cst_14 = arith.constant dense<0.000000e+00> : vector<16x128xf32>
    %18 = tpu.matmul %16, %17, %cst_14 {dimension_numbers = #tpu.dot_dimension_numbers<[1], [0], [0], [1], [0, 0, 1, 1], [], []>} : vector<16x128xbf16>, vector<128x128xbf16>, vector<16x128xf32> -> vector<16x128xf32>
    %c0_15 = arith.constant 0 : index
    %c0_16 = arith.constant 0 : index
    %19 = vector.load %arg7[%c0_15, %c0_16] : memref<1x128xf32, #tpu.memory_space<vmem>>, vector<1x128xf32>
    %20 = vector.broadcast %19 : vector<1x128xf32> to vector<16x128xf32>
    %21 = arith.addf %18, %20 : vector<16x128xf32>
    %cst_17 = arith.constant 0.000000e+00 : f32
    %22 = vector.broadcast %cst_17 : f32 to vector<16x128xf32>
    %23 = arith.maximumf %21, %22 : vector<16x128xf32>
    %24 = arith.truncf %23 : vector<16x128xf32> to vector<16x128xbf16>
    %c0_18 = arith.constant 0 : index
    %c0_19 = arith.constant 0 : index
    %25 = vector.load %arg8[%c0_18, %c0_19] : memref<128x128xbf16, #tpu.memory_space<vmem>>, vector<128x128xbf16>
    %cst_20 = arith.constant dense<0.000000e+00> : vector<16x128xf32>
    %26 = tpu.matmul %24, %25, %cst_20 {dimension_numbers = #tpu.dot_dimension_numbers<[1], [0], [0], [1], [0, 0, 1, 1], [], []>} : vector<16x128xbf16>, vector<128x128xbf16>, vector<16x128xf32> -> vector<16x128xf32>
    %c0_21 = arith.constant 0 : index
    %c0_22 = arith.constant 0 : index
    %27 = vector.load %arg9[%c0_21, %c0_22] : memref<1x128xf32, #tpu.memory_space<vmem>>, vector<1x128xf32>
    %28 = vector.broadcast %27 : vector<1x128xf32> to vector<16x128xf32>
    %29 = arith.addf %26, %28 : vector<16x128xf32>
    %30 = arith.negf %29 : vector<16x128xf32>
    %31 = math.exp %30 : vector<16x128xf32>
    %cst_23 = arith.constant 1.000000e+00 : f32
    %32 = vector.broadcast %cst_23 : f32 to vector<16x128xf32>
    %33 = arith.addf %32, %31 : vector<16x128xf32>
    %34 = arith.divf %32, %33 : vector<16x128xf32>
    %c0_24 = arith.constant 0 : index
    %c0_25 = arith.constant 0 : index
    %35 = vector.load %arg10[%c0_24, %c0_25] : memref<16x128xf32, #tpu.memory_space<vmem>>, vector<16x128xf32>
    tpu.vector_store %arg10[%c0_24, %c0_25], %34 {strides = array<i32>} : memref<16x128xf32, #tpu.memory_space<vmem>>, vector<16x128xf32>,
    return
  }
  func.func @transform_0(%arg0: i32) -> (i32, i32) {
    %c0_i32 = arith.constant 0 : i32
    %c0_i32_0 = arith.constant 0 : i32
    return %arg0, %c0_i32 : i32, i32
  }
  func.func @transform_1(%arg0: i32) -> (i32, i32) {
    %c0_i32 = arith.constant 0 : i32
    %c0_i32_0 = arith.constant 0 : i32
    %c0_i32_1 = arith.constant 0 : i32
    return %c0_i32, %c0_i32_0 : i32, i32
  }
  func.func @transform_2(%arg0: i32) -> (i32, i32) {
    %c0_i32 = arith.constant 0 : i32
    %c0_i32_0 = arith.constant 0 : i32
    %c0_i32_1 = arith.constant 0 : i32
    return %c0_i32, %c0_i32_0 : i32, i32
  }
  func.func @transform_3(%arg0: i32) -> (i32, i32) {
    %c0_i32 = arith.constant 0 : i32
    %c0_i32_0 = arith.constant 0 : i32
    %c0_i32_1 = arith.constant 0 : i32
    return %c0_i32, %c0_i32_0 : i32, i32
  }
  func.func @transform_4(%arg0: i32) -> (i32, i32) {
    %c0_i32 = arith.constant 0 : i32
    %c0_i32_0 = arith.constant 0 : i32
    %c0_i32_1 = arith.constant 0 : i32
    return %c0_i32, %c0_i32_0 : i32, i32
  }
  func.func @transform_5(%arg0: i32) -> (i32, i32) {
    %c0_i32 = arith.constant 0 : i32
    %c0_i32_0 = arith.constant 0 : i32
    %c0_i32_1 = arith.constant 0 : i32
    return %c0_i32, %c0_i32_0 : i32, i32
  }
  func.func @transform_6(%arg0: i32) -> (i32, i32) {
    %c0_i32 = arith.constant 0 : i32
    %c0_i32_0 = arith.constant 0 : i32
    %c0_i32_1 = arith.constant 0 : i32
    return %c0_i32, %c0_i32_0 : i32, i32
  }
  func.func @transform_7(%arg0: i32) -> (i32, i32) {
    %c0_i32 = arith.constant 0 : i32
    %c0_i32_0 = arith.constant 0 : i32
    %c0_i32_1 = arith.constant 0 : i32
    return %c0_i32, %c0_i32_0 : i32, i32
  }
  func.func @transform_8(%arg0: i32) -> (i32, i32) {
    %c0_i32 = arith.constant 0 : i32
    %c0_i32_0 = arith.constant 0 : i32
    %c0_i32_1 = arith.constant 0 : i32
    return %c0_i32, %c0_i32_0 : i32, i32
  }
  func.func @transform_9(%arg0: i32) -> (i32, i32) {
    %c0_i32 = arith.constant 0 : i32
    %c0_i32_0 = arith.constant 0 : i32
    return %arg0, %c0_i32 : i32, i32
  }
}

</mosaic_0001>

<bundles_post_ra>
// kernel: net_forward.1
= control target key start
LH: loop header
LB: loop body
LE: loop exit
PB: predicated region body
PF: predicated region fallthrough
CT: control target
= control target key end

     0   :  { %14 = vsyncpa [#allocation3], 0  ;;  %s6932_s0 = inlined_call_operand.vmem [shape: bf16[16,6144], index: 0, kind: input, shape index: {}]   ;;  %s6933_s1 = inlined_call_operand.hbm [shape: bf16[6144,128], index: 1, kind: input, shape index: {}]   ;;  %s6934_s2 = inlined_call_operand.hbm [shape: f32[1,128], index: 2, kind: input, shape index: {}]   ;;  %s6935_s3 = inlined_call_operand.hbm [shape: bf16[128,128], index: 3, kind: input, shape index: {}]   ;;  %s6936_s4 = inlined_call_operand.hbm [shape: f32[1,128], index: 4, kind: input, shape index: {}]   ;;  %s6937_s5 = inlined_call_operand.hbm [shape: bf16[128,128], index: 5, kind: input, shape index: {}]   ;;  %s6938_s6 = inlined_call_operand.hbm [shape: f32[1,128], index: 6, kind: input, shape index: {}]   ;;  %s6939_s7 = inlined_call_operand.hbm [shape: bf16[128,128], index: 7, kind: input, shape index: {}]   ;;  %s6940_s8 = inlined_call_operand.hbm [shape: f32[1,128], index: 8, kind: input, shape index: {}]   ;;  %s6941_s9 = inlined_call_operand.vmem [shape: f32[16,128], index: 9, kind: output, shape index: {}]  }
   0x1   :  { %15 = vsyncpa [#allocation5], 0 }
   0x2   :  { %16 = vsyncpa [#allocation8], 0 }
   0x3   :  { %17 = vsyncpa [#allocation11], 0 }
   0x4   :  { %18 = vsyncpa [#allocation14], 0  ;;  %s6544_s30 = smov [#allocation4]   ;;  %s6545_s11 = smov [#allocation7]  }
   0x5   :  { %s39_s10 = sshll.u32 %s6544_s30, 4  ;;  %s61_s12 = sshll.u32 %s6545_s11, 4  ;;  %s40_s10 = int_to_ptr.vmem [resolvable:$true] %s39_s10  ;;  %s62_s12 = int_to_ptr.vmem [resolvable:$true] %s61_s12 }
   0x6   :  { %s6358_s15 = scalar_lea.hbm %s6934_s2, 16 }
   0x7   :  { %p6359_p0 = scmp.ne.s32.totalorder %s6934_s2, %s6358_s15  ;;  %p6362_p1 = scmp.lt.u32.totalorder %s6358_s15, %s6934_s2 }
   0x9   :  { %p6364_p2 = pnand %p6362_p1, %p6359_p0 }
   0xb   :  { %6367 = shalt.err (!%p6364_p2)
}
   0xc   :  { %s6368_s20 = scalar_lea.vmem %s40_s10, 16  ;;  %s6372_s21 = scalar_lea.vmem %s40_s10, 32 }
   0xd   :  { %p6369_p3 = scmp.ne.s32.totalorder %s40_s10, %s6368_s20  ;;  %p6373_p4 = scmp.lt.s32.totalorder %s40_s10, %s40_s10 }
   0xe   :  { %p6374_p5 = scmp.lt.s32.totalorder %s6372_s21, %s6368_s20 }
  0x10   :  { %p6375_p6 = por %p6374_p5, %p6373_p4 }
  0x12   :  { %p6376_p7 = pnand %p6375_p6, %p6369_p3 }
  0x14   :  { %6379 = shalt.err (!%p6376_p7)
}
  0x15   :  { %42 = dma.hbm_to_vmem [thread:$0]  %s6934_s2, 16, %s40_s10, [#allocation5]  }
  0x16   :  { %s6380_s26 = scalar_lea.hbm %s6936_s4, 16 }
  0x17   :  { %p6381_p8 = scmp.ne.s32.totalorder %s6936_s4, %s6380_s26  ;;  %p6384_p9 = scmp.lt.u32.totalorder %s6380_s26, %s6936_s4 }
  0x19   :  { %p6386_p10 = pnand %p6384_p9, %p6381_p8 }
  0x1b   :  { %6389 = shalt.err (!%p6386_p10)
}
  0x1c   :  { %s6390_s11 = scalar_lea.vmem %s62_s12, 16  ;;  %s6394_s13 = scalar_lea.vmem %s62_s12, 32 }
  0x1d   :  { %p6391_p11 = scmp.ne.s32.totalorder %s62_s12, %s6390_s11  ;;  %p6395_p12 = scmp.lt.s32.totalorder %s62_s12, %s62_s12 }
  0x1e   :  { %p6396_p13 = scmp.lt.s32.totalorder %s6394_s13, %s6390_s11 }
  0x20   :  { %p6397_p0 = por %p6396_p13, %p6395_p12 }
  0x22   :  { %p6398_p1 = pnand %p6397_p0, %p6391_p11 }
  0x24   :  { %6401 = shalt.err (!%p6398_p1)
}
  0x25   :  { %64 = dma.hbm_to_vmem [thread:$0]  %s6936_s4, 16, %s62_s12, [#allocation8]  }
  0x26   :  { %s6546_s14 = smov [#allocation10]   ;;  %s6547_s16 = smov [#allocation2]  }
  0x27   :  { %s83_s15 = sshll.u32 %s6546_s14, 4  ;;  %s26_s17 = sshll.u32 %s6547_s16, 4  ;;  %s84_s15 = int_to_ptr.vmem [resolvable:$true] %s83_s15  ;;  %s6630_s17 = int_to_ptr.vmem [resolvable:$true] %s26_s17 }
  0x28   :  { %s6402_s20 = scalar_lea.hbm %s6938_s6, 16 }
  0x29   :  { %p6403_p2 = scmp.ne.s32.totalorder %s6938_s6, %s6402_s20  ;;  %p6406_p3 = scmp.lt.u32.totalorder %s6402_s20, %s6938_s6 }
  0x2b   :  { %p6408_p4 = pnand %p6406_p3, %p6403_p2 }
  0x2d   :  { %6411 = shalt.err (!%p6408_p4)
}
  0x2e   :  { %s6412_s4 = scalar_lea.vmem %s84_s15, 16  ;;  %s6416_s12 = scalar_lea.vmem %s84_s15, 32 }
  0x2f   :  { %p6413_p5 = scmp.ne.s32.totalorder %s84_s15, %s6412_s4  ;;  %p6417_p6 = scmp.lt.s32.totalorder %s84_s15, %s84_s15 }
  0x30   :  { %p6418_p7 = scmp.lt.s32.totalorder %s6416_s12, %s6412_s4 }
  0x32   :  { %p6419_p8 = por %p6418_p7, %p6417_p6 }
  0x34   :  { %p6420_p9 = pnand %p6419_p8, %p6413_p5 }
  0x36   :  { %6423 = shalt.err (!%p6420_p9)
}
  0x37   :  { %86 = dma.hbm_to_vmem [thread:$0]  %s6938_s6, 16, %s84_s15, [#allocation11]  }
  0x38   :  { %s6424_s29 = scalar_lea.hbm %s6933_s1, 49152 }
  0x39   :  { %p6425_p10 = scmp.ne.s32.totalorder %s6933_s1, %s6424_s29  ;;  %p6428_p11 = scmp.lt.u32.totalorder %s6424_s29, %s6933_s1 }
  0x3b   :  { %p6430_p12 = pnand %p6428_p11, %p6425_p10 }
  0x3d   :  { %6433 = shalt.err (!%p6430_p12)
}
  0x3e   :  { %s6434_s10 = scalar_lea.vmem %s6630_s17, 49152  ;;  %p6439_p0 = scmp.lt.s32.totalorder %s6630_s17, %s6630_s17 }
  0x3f   :  { %p6435_p13 = scmp.ne.s32.totalorder %s6630_s17, %s6434_s10  ;;  %p6440_p1 = scmp.lt.s32.totalorder %s6434_s10, %s6434_s10 }
  0x41   :  { %p6441_p2 = por %p6440_p1, %p6439_p0 }
  0x43   :  { %p6442_p3 = pnand %p6441_p2, %p6435_p13 }
  0x45   :  { %6445 = shalt.err (!%p6442_p3)
}
  0x46   :  { %s6548_s6 = smov 64   ;;  %s6549_s14 = smov 4  }
  0x47   :  { %32 = dma.hbm_to_vmem [thread:$0]  %s6933_s1, 49152, %s6630_s17, [#allocation3], %s6548_s6, %s6548_s6, %s6549_s14  }
  0x48   :  { %s6550_s18 = smov [#allocation6]   ;;  %s6551_s20 = smov [#allocation9]  }
  0x49   :  { %s48_s19 = sshll.u32 %s6550_s18, 4  ;;  %s70_s21 = sshll.u32 %s6551_s20, 4  ;;  %s49_s19 = int_to_ptr.vmem [resolvable:$true] %s48_s19  ;;  %s6664_s21 = int_to_ptr.vmem [resolvable:$true] %s70_s21 }
  0x4a   :  { %s6446_s24 = scalar_lea.hbm %s6935_s3, 1024 }
  0x4b   :  { %p6447_p4 = scmp.ne.s32.totalorder %s6935_s3, %s6446_s24  ;;  %p6450_p5 = scmp.lt.u32.totalorder %s6446_s24, %s6935_s3 }
  0x4d   :  { %p6452_p6 = pnand %p6450_p5, %p6447_p4 }
  0x4f   :  { %6455 = shalt.err (!%p6452_p6)
}
  0x50   :  { %s6456_s1 = scalar_lea.vmem %s49_s19, 1024  ;;  %p6461_p8 = scmp.lt.s32.totalorder %s49_s19, %s49_s19 }
  0x51   :  { %p6457_p7 = scmp.ne.s32.totalorder %s49_s19, %s6456_s1  ;;  %p6462_p9 = scmp.lt.s32.totalorder %s6456_s1, %s6456_s1 }
  0x53   :  { %p6463_p10 = por %p6462_p9, %p6461_p8 }
  0x55   :  { %p6464_p11 = pnand %p6463_p10, %p6457_p7 }
  0x57   :  { %6467 = shalt.err (!%p6464_p11)
}
  0x58   :  { %54 = dma.hbm_to_vmem [thread:$0]  %s6935_s3, 1024, %s49_s19, [#allocation5], %s6548_s6, %s6548_s6, %s6549_s14  }
  0x59   :  { %s6468_s30 = scalar_lea.hbm %s6937_s5, 1024 }
  0x5a   :  { %p6469_p12 = scmp.ne.s32.totalorder %s6937_s5, %s6468_s30  ;;  %p6472_p13 = scmp.lt.u32.totalorder %s6468_s30, %s6937_s5 }
  0x5c   :  { %p6474_p0 = pnand %p6472_p13, %p6469_p12 }
  0x5e   :  { %6477 = shalt.err (!%p6474_p0)
}
  0x5f   :  { %s6478_s15 = scalar_lea.vmem %s6664_s21, 1024  ;;  %p6483_p2 = scmp.lt.s32.totalorder %s6664_s21, %s6664_s21 }
  0x60   :  { %p6479_p1 = scmp.ne.s32.totalorder %s6664_s21, %s6478_s15  ;;  %p6484_p3 = scmp.lt.s32.totalorder %s6478_s15, %s6478_s15 }
  0x62   :  { %p6485_p4 = por %p6484_p3, %p6483_p2 }
  0x64   :  { %p6486_p5 = pnand %p6485_p4, %p6479_p1 }
  0x66   :  { %6489 = shalt.err (!%p6486_p5)
}
  0x67   :  { %76 = dma.hbm_to_vmem [thread:$0]  %s6937_s5, 1024, %s6664_s21, [#allocation8], %s6548_s6, %s6548_s6, %s6549_s14  }
  0x68   :  { %s6552_s18 = smov [#allocation12]   ;;  %s6553_s20 = smov [#allocation13]  }
  0x69   :  { %s92_s19 = sshll.u32 %s6552_s18, 4  ;;  %s105_s22 = sshll.u32 %s6553_s20, 4  ;;  %s93_s19 = int_to_ptr.vmem [resolvable:$true] %s92_s19  ;;  %s106_s22 = int_to_ptr.vmem [resolvable:$true] %s105_s22 }
  0x6a   :  { %s6490_s4 = scalar_lea.hbm %s6939_s7, 1024 }
  0x6b   :  { %p6491_p6 = scmp.ne.s32.totalorder %s6939_s7, %s6490_s4  ;;  %p6494_p7 = scmp.lt.u32.totalorder %s6490_s4, %s6939_s7 }
  0x6d   :  { %p6496_p8 = pnand %p6494_p7, %p6491_p6 }
  0x6f   :  { %6499 = shalt.err (!%p6496_p8)
}
  0x70   :  { %s6500_s5 = scalar_lea.vmem %s93_s19, 1024  ;;  %p6505_p10 = scmp.lt.s32.totalorder %s93_s19, %s93_s19 }
  0x71   :  { %p6501_p9 = scmp.ne.s32.totalorder %s93_s19, %s6500_s5  ;;  %p6506_p11 = scmp.lt.s32.totalorder %s6500_s5, %s6500_s5 }
  0x73   :  { %p6507_p12 = por %p6506_p11, %p6505_p10 }
  0x75   :  { %p6508_p13 = pnand %p6507_p12, %p6501_p9 }
  0x77   :  { %6511 = shalt.err (!%p6508_p13)
}
  0x78   :  { %98 = dma.hbm_to_vmem [thread:$0]  %s6939_s7, 1024, %s93_s19, [#allocation11], %s6548_s6, %s6548_s6, %s6549_s14  }
  0x79   :  { %s6512_s29 = scalar_lea.hbm %s6940_s8, 16 }
  0x7a   :  { %p6513_p0 = scmp.ne.s32.totalorder %s6940_s8, %s6512_s29  ;;  %p6516_p1 = scmp.lt.u32.totalorder %s6512_s29, %s6940_s8 }
  0x7c   :  { %p6518_p2 = pnand %p6516_p1, %p6513_p0 }
  0x7e   :  { %6521 = shalt.err (!%p6518_p2)
}
  0x7f   :  { %s6522_s10 = scalar_lea.vmem %s106_s22, 16  ;;  %s6526_s15 = scalar_lea.vmem %s106_s22, 32 }
  0x80   :  { %p6523_p3 = scmp.ne.s32.totalorder %s106_s22, %s6522_s10  ;;  %p6527_p4 = scmp.lt.s32.totalorder %s106_s22, %s106_s22 }
  0x81   :  { %p6528_p5 = scmp.lt.s32.totalorder %s6526_s15, %s6522_s10 }
  0x83   :  { %p6529_p6 = por %p6528_p5, %p6527_p4 }
  0x85   :  { %p6530_p7 = pnand %p6529_p6, %p6523_p3 }
  0x87   :  { %6533 = shalt.err (!%p6530_p7)
}
  0x88   :  { %108 = dma.hbm_to_vmem [thread:$0]  %s6940_s8, 16, %s106_s22, [#allocation14]  }
  0x89   :  { %6534 = dma.done.wait [#allocation3], 49152  }
  0x8a   :  { %6535 = vsyncadd [#allocation3], 4294918144 }
  0x8b   :  { %6536 = dma.done.wait [#allocation5], 1040  }
  0x8c   :  { %6537 = vsyncadd [#allocation5], 4294966256 }
  0x8d   :  { %6538 = dma.done.wait [#allocation8], 1040  }
  0x8e   :  { %6539 = vsyncadd [#allocation8], 4294966256 }
  0x8f   :  { %6540 = dma.done.wait [#allocation11], 1040  }
  0x90   :  { %6541 = vsyncadd [#allocation11], 4294966256 }
  0x91   :  { %6542 = dma.done.wait [#allocation14], 16  }
  0x92   :  { %6543 = vsyncadd [#allocation14], 4294967280  ;;  %v5942_v0 = vld [vmem:[#allocation2 + $0x40] sm:$0xff]   ;;  %v5946_v4 = vld [vmem:[#allocation2 + $0x48] sm:$0xff]   ;;  %vm6555_vm0 = vmmov 0  }
  0x93   :  { %v5943_v1 = vld [vmem:[#allocation2 + $0xc0] sm:$0xff]   ;;  %5315 = vmatprep.subr.bf16.mxu0 %v5942_v0  ;;  %v5947_v5 = vld [vmem:[#allocation2 + $0xc8] sm:$0xff]   ;;  %v5950_v8 = vld [vmem:[#allocation2 + $0x50] sm:$0xff]  }
  0x94   :  { %v5944_v2 = vld [vmem:[#allocation2] sm:$0xff]   ;;  %5337 = vmatprep.subr.bf16.mxu1 %v5943_v1  ;;  %v5948_v6 = vld [vmem:[#allocation2 + $0x8] sm:$0xff]   ;;  %v5951_v9 = vld [vmem:[#allocation2 + $0xd0] sm:$0xff]  }
  0x95   :  { %v5945_v3 = vld [vmem:[#allocation2 + $0x80] sm:$0xff]   ;;  %5316 = vmatpush3.bf16.msra.mxu0 %v5944_v2  ;;  %v5949_v7 = vld [vmem:[#allocation2 + $0x88] sm:$0xff]   ;;  %v5952_v10 = vld [vmem:[#allocation2 + $0x10] sm:$0xff]  }
  0x96   :  { %5338 = vmatpush3.bf16.msra.mxu1 %v5945_v3  ;;  %5317 = vmatprep.subr.bf16.mxu0 %v5946_v4  ;;  %v5953_v11 = vld [vmem:[#allocation2 + $0x90] sm:$0xff]   ;;  %v5954_v12 = vld [vmem:[#allocation2 + $0x58] sm:$0xff]   ;;  %v5958_v16 = vld [vmem:[#allocation2 + $0x60] sm:$0xff]  }
  0x97   :  { %5339 = vmatprep.subr.bf16.mxu1 %v5947_v5  ;;  %v5955_v13 = vld [vmem:[#allocation2 + $0xd8] sm:$0xff]   ;;  %v5959_v17 = vld [vmem:[#allocation2 + $0xe0] sm:$0xff]   ;;  %v5962_v20 = vld [vmem:[#allocation2 + $0x68] sm:$0xff]  }
  0x98   :  { %v5956_v14 = vld [vmem:[#allocation2 + $0x18] sm:$0xff]   ;;  %v5960_v18 = vld [vmem:[#allocation2 + $0x20] sm:$0xff]   ;;  %v5963_v21 = vld [vmem:[#allocation2 + $0xe8] sm:$0xff]  }
  0x99   :  { %5318 = vmatpush3.bf16.msra.mxu0 %v5948_v6  ;;  %v5957_v15 = vld [vmem:[#allocation2 + $0x98] sm:$0xff]   ;;  %v5961_v19 = vld [vmem:[#allocation2 + $0xa0] sm:$0xff]   ;;  %v5964_v22 = vld [vmem:[#allocation2 + $0x28] sm:$0xff]  }
  0x9a   :  { %5340 = vmatpush3.bf16.msra.mxu1 %v5949_v7  ;;  %5319 = vmatprep.subr.bf16.mxu0 %v5950_v8  ;;  %v5965_v23 = vld [vmem:[#allocation2 + $0xa8] sm:$0xff]   ;;  %v5966_v24 = vld [vmem:[#allocation2 + $0x70] sm:$0xff]   ;;  %v5970_v28 = vld [vmem:[#allocation2 + $0x78] sm:$0xff]  }
  0x9b   :  { %5341 = vmatprep.subr.bf16.mxu1 %v5951_v9  ;;  %v5967_v25 = vld [vmem:[#allocation2 + $0xf0] sm:$0xff]   ;;  %v5971_v29 = vld [vmem:[#allocation2 + $0xf8] sm:$0xff]   ;;  %v134_v32 = vld [vmem:[%s6932_s0] sm:$0xff] }
  0x9c   :  { %v5968_v26 = vld [vmem:[#allocation2 + $0x30] sm:$0xff]   ;;  %v5972_v30 = vld [vmem:[#allocation2 + $0x38] sm:$0xff]   ;;  %v158_v33 = vld [vmem:[%s6932_s0 + $0xc0] sm:$0xff] }
  0x9d   :  { %5320 = vmatpush3.bf16.msra.mxu0 %v5952_v10  ;;  %v5969_v27 = vld [vmem:[#allocation2 + $0xb0] sm:$0xff]   ;;  %v5973_v31 = vld [vmem:[#allocation2 + $0xb8] sm:$0xff]   ;;  %v135_v34 = vld [vmem:[%s6932_s0 + $0x8] sm:$0xff]  ;;  %v4854_v35 = vcombine.low %v134_v32, %v158_v33  ;;  %v4855_v36 = vcombine.high %v134_v32, %v158_v33 }
  0x9e   :  { %5342 = vmatpush3.bf16.msra.mxu1 %v5953_v11  ;;  %5321 = vmatprep.subr.bf16.mxu0 %v5954_v12  ;;  %v159_v37 = vld [vmem:[%s6932_s0 + $0xc8] sm:$0xff]  ;;  %v5974_v40 = vld [vmem:[#allocation2 + $0x140] sm:$0xff]   ;;  %v5982_v48 = vld [vmem:[#allocation2 + $0x150] sm:$0xff]  }
  0x9f   :  { %5343 = vmatprep.subr.bf16.mxu1 %v5955_v13  ;;  %v4856_v38 = vcombine.low %v135_v34, %v159_v37  ;;  %v4857_v39 = vcombine.high %v135_v34, %v159_v37  ;;  %3533 = vmatprep.mubr.bf16.mxu0 %v4855_v36  ;;  %v5975_v41 = vld [vmem:[#allocation2 + $0x1c0] sm:$0xff]   ;;  %v5978_v44 = vld [vmem:[#allocation2 + $0x148] sm:$0xff]   ;;  %v5983_v49 = vld [vmem:[#allocation2 + $0x1d0] sm:$0xff]  }
  0xa0   :  { %v5976_v42 = vld [vmem:[#allocation2 + $0x100] sm:$0xff]   ;;  %v5979_v45 = vld [vmem:[#allocation2 + $0x1c8] sm:$0xff]   ;;  %v5984_v50 = vld [vmem:[#allocation2 + $0x110] sm:$0xff]  }
  0xa1   :  { %5322 = vmatpush3.bf16.msra.mxu0 %v5956_v14  ;;  %3574 = vmatprep.mubr.bf16.mxu1 %v4857_v39  ;;  %v5977_v43 = vld [vmem:[#allocation2 + $0x180] sm:$0xff]   ;;  %v5980_v46 = vld [vmem:[#allocation2 + $0x108] sm:$0xff]   ;;  %v5985_v51 = vld [vmem:[#allocation2 + $0x190] sm:$0xff]  }
  0xa2   :  { %5344 = vmatpush3.bf16.msra.mxu1 %v5957_v15  ;;  %5323 = vmatprep.subr.bf16.mxu0 %v5958_v16  ;;  %v5981_v47 = vld [vmem:[#allocation2 + $0x188] sm:$0xff]   ;;  %v5986_v52 = vld [vmem:[#allocation2 + $0x158] sm:$0xff]   ;;  %v5990_v56 = vld [vmem:[#allocation2 + $0x160] sm:$0xff]  }
  0xa3   :  { %5345 = vmatprep.subr.bf16.mxu1 %v5959_v17  ;;  %v5987_v53 = vld [vmem:[#allocation2 + $0x1d8] sm:$0xff]   ;;  %v5991_v57 = vld [vmem:[#allocation2 + $0x1e0] sm:$0xff]   ;;  %v5994_v60 = vld [vmem:[#allocation2 + $0x168] sm:$0xff]  }
  0xa4   :  { %v5988_v54 = vld [vmem:[#allocation2 + $0x118] sm:$0xff]   ;;  %v5992_v58 = vld [vmem:[#allocation2 + $0x120] sm:$0xff]   ;;  %v5995_v61 = vld [vmem:[#allocation2 + $0x1e8] sm:$0xff]  }
  0xa5   :  { %5324 = vmatpush3.bf16.msra.mxu0 %v5960_v18  ;;  %v5989_v55 = vld [vmem:[#allocation2 + $0x198] sm:$0xff]   ;;  %v5993_v59 = vld [vmem:[#allocation2 + $0x1a0] sm:$0xff]   ;;  %v5996_v62 = vld [vmem:[#allocation2 + $0x128] sm:$0xff]  }
  0xa6   :  { %5346 = vmatpush3.bf16.msra.mxu1 %v5961_v19  ;;  %5325 = vmatprep.subr.bf16.mxu0 %v5962_v20  ;;  %v5997_v63 = vld [vmem:[#allocation2 + $0x1a8] sm:$0xff]   ;;  %v5998_v0 = vld [vmem:[#allocation2 + $0x170] sm:$0xff]   ;;  %v6002_v4 = vld [vmem:[#allocation2 + $0x178] sm:$0xff]  }
  0xa7   :  { %5347 = vmatprep.subr.bf16.mxu1 %v5963_v21  ;;  %v5999_v1 = vld [vmem:[#allocation2 + $0x1f0] sm:$0xff]   ;;  %v6003_v5 = vld [vmem:[#allocation2 + $0x1f8] sm:$0xff]   ;;  %v6006_v16 = vld [vmem:[#allocation2 + $0x240] sm:$0xff]  }
  0xa8   :  { %v6000_v2 = vld [vmem:[#allocation2 + $0x130] sm:$0xff]   ;;  %v6004_v6 = vld [vmem:[#allocation2 + $0x138] sm:$0xff]   ;;  %v6007_v17 = vld [vmem:[#allocation2 + $0x2c0] sm:$0xff]  }
  0xa9   :  { %5326 = vmatpush3.bf16.msra.mxu0 %v5964_v22  ;;  %v6001_v3 = vld [vmem:[#allocation2 + $0x1b0] sm:$0xff]   ;;  %v6005_v7 = vld [vmem:[#allocation2 + $0x1b8] sm:$0xff]   ;;  %v6008_v18 = vld [vmem:[#allocation2 + $0x200] sm:$0xff]  }
  0xaa   :  { %5348 = vmatpush3.bf16.msra.mxu1 %v5965_v23  ;;  %5327 = vmatprep.subr.bf16.mxu0 %v5966_v24  ;;  %v136_v8 = vld [vmem:[%s6932_s0 + $0x10] sm:$0xff]  ;;  %v137_v12 = vld [vmem:[%s6932_s0 + $0x18] sm:$0xff]  ;;  %v6009_v19 = vld [vmem:[#allocation2 + $0x280] sm:$0xff]  }
  0xab   :  { %5349 = vmatprep.subr.bf16.mxu1 %v5967_v25  ;;  %v160_v9 = vld [vmem:[%s6932_s0 + $0xd0] sm:$0xff]  ;;  %v161_v13 = vld [vmem:[%s6932_s0 + $0xd8] sm:$0xff]  ;;  %v6010_v20 = vld [vmem:[#allocation2 + $0x248] sm:$0xff]  }
  0xac   :  { %v4858_v10 = vcombine.low %v136_v8, %v160_v9  ;;  %v4859_v11 = vcombine.high %v136_v8, %v160_v9  ;;  %v4860_v14 = vcombine.low %v137_v12, %v161_v13  ;;  %v4861_v15 = vcombine.high %v137_v12, %v161_v13  ;;  %v6011_v21 = vld [vmem:[#allocation2 + $0x2c8] sm:$0xff]   ;;  %v6014_v24 = vld [vmem:[#allocation2 + $0x250] sm:$0xff]   ;;  %v6022_v32 = vld [vmem:[#allocation2 + $0x260] sm:$0xff]  }
  0xad   :  { %5328 = vmatpush3.bf16.msra.mxu0 %v5968_v26  ;;  %v6012_v22 = vld [vmem:[#allocation2 + $0x208] sm:$0xff]   ;;  %v6015_v25 = vld [vmem:[#allocation2 + $0x2d0] sm:$0xff]   ;;  %v6023_v33 = vld [vmem:[#allocation2 + $0x2e0] sm:$0xff]  }
  0xae   :  { %5350 = vmatpush3.bf16.msra.mxu1 %v5969_v27  ;;  %5329 = vmatprep.subr.bf16.mxu0 %v5970_v28  ;;  %v6013_v23 = vld [vmem:[#allocation2 + $0x288] sm:$0xff]   ;;  %v6016_v26 = vld [vmem:[#allocation2 + $0x210] sm:$0xff]   ;;  %v6018_v28 = vld [vmem:[#allocation2 + $0x258] sm:$0xff]  }
  0xaf   :  { %5351 = vmatprep.subr.bf16.mxu1 %v5971_v29  ;;  %v6017_v27 = vld [vmem:[#allocation2 + $0x290] sm:$0xff]   ;;  %v6019_v29 = vld [vmem:[#allocation2 + $0x2d8] sm:$0xff]   ;;  %v6024_v34 = vld [vmem:[#allocation2 + $0x220] sm:$0xff]  }
  0xb0   :  { %v6026_v36 = vld [vmem:[#allocation2 + $0x268] sm:$0xff]   ;;  %v6054_v8 = vld [vmem:[#allocation2 + $0x360] sm:$0xff]  }
  0xb1   :  { %5330 = vmatpush3.bf16.msra.mxu0 %v5972_v30  ;;  %v6020_v30 = vld [vmem:[#allocation2 + $0x218] sm:$0xff]   ;;  %v6027_v37 = vld [vmem:[#allocation2 + $0x2e8] sm:$0xff]   ;;  %v6055_v9 = vld [vmem:[#allocation2 + $0x3e0] sm:$0xff]  }
  0xb2   :  { %5352 = vmatpush3.bf16.msra.mxu1 %v5973_v31  ;;  %5359 = vmatprep.subr.bf16.mxu0 %v5974_v40  ;;  %v6021_v31 = vld [vmem:[#allocation2 + $0x298] sm:$0xff]   ;;  %v6029_v39 = vld [vmem:[#allocation2 + $0x2a8] sm:$0xff]   ;;  %v6030_v40 = vld [vmem:[#allocation2 + $0x270] sm:$0xff]  }
  0xb3   :  { %5381 = vmatprep.subr.bf16.mxu1 %v5975_v41  ;;  %v6031_v41 = vld [vmem:[#allocation2 + $0x2f0] sm:$0xff]   ;;  %v6058_v12 = vld [vmem:[#allocation2 + $0x368] sm:$0xff]  }
  0xb4   :  { %3534 = vmatmul.mubr.bf16.vlgmr.msra.gmra.mrb[0].mxu0 %v4854_v35  ;;  %v6025_v35 = vld [vmem:[#allocation2 + $0x2a0] sm:$0xff]   ;;  %v6059_v13 = vld [vmem:[#allocation2 + $0x3e8] sm:$0xff]  }
  0xb5   :  { %3575 = vmatmul.mubr.bf16.vlgmr.msra.gmra.mrb[0].mxu1 %v4856_v38  ;;  %5360 = vmatpush3.bf16.msra.mxu0 %v5976_v42  ;;  %v6028_v38 = vld [vmem:[#allocation2 + $0x228] sm:$0xff]   ;;  %v6032_v42 = vld [vmem:[#allocation2 + $0x230] sm:$0xff]  }
  0xb6   :  { %5382 = vmatpush3.bf16.msra.mxu1 %v5977_v43  ;;  %5361 = vmatprep.subr.bf16.mxu0 %v5978_v44  ;;  %v6033_v43 = vld [vmem:[#allocation2 + $0x2b0] sm:$0xff]   ;;  %v6034_v44 = vld [vmem:[#allocation2 + $0x278] sm:$0xff]  }
  0xb7   :  { %5383 = vmatprep.subr.bf16.mxu1 %v5979_v45  ;;  %3615 = vmatprep.mubr.bf16.mxu0 %v4859_v11  ;;  %v6035_v45 = vld [vmem:[#allocation2 + $0x2f8] sm:$0xff]   ;;  %v6057_v11 = vld [vmem:[#allocation2 + $0x3a0] sm:$0xff]  }
  0xb8   :  { %3656 = vmatprep.mubr.bf16.mxu1 %v4861_v15  ;;  %v6061_v15 = vld [vmem:[#allocation2 + $0x3a8] sm:$0xff]  }
  0xb9   :  { %5362 = vmatpush3.bf16.msra.mxu0 %v5980_v46  ;;  %v6036_v46 = vld [vmem:[#allocation2 + $0x238] sm:$0xff]  }
  0xba   :  { %5384 = vmatpush3.bf16.msra.mxu1 %v5981_v47  ;;  %5363 = vmatprep.subr.bf16.mxu0 %v5982_v48  ;;  %v6037_v47 = vld [vmem:[#allocation2 + $0x2b8] sm:$0xff]   ;;  %v138_v48 = vld [vmem:[%s6932_s0 + $0x20] sm:$0xff] }
  0xbb   :  { %5385 = vmatprep.subr.bf16.mxu1 %v5983_v49  ;;  %v162_v49 = vld [vmem:[%s6932_s0 + $0xe0] sm:$0xff] }
  0xbd   :  { %5364 = vmatpush3.bf16.msra.mxu0 %v5984_v50  ;;  %v139_v50 = vld [vmem:[%s6932_s0 + $0x28] sm:$0xff] }
  0xbe   :  { %5386 = vmatpush3.bf16.msra.mxu1 %v5985_v51  ;;  %5365 = vmatprep.subr.bf16.mxu0 %v5986_v52  ;;  %v163_v51 = vld [vmem:[%s6932_s0 + $0xe8] sm:$0xff]  ;;  %v4862_v52 = vcombine.low %v138_v48, %v162_v49 }
  0xbf   :  { %5387 = vmatprep.subr.bf16.mxu1 %v5987_v53  ;;  %v4863_v53 = vcombine.high %v138_v48, %v162_v49  ;;  %v6086_v48 = vld [vmem:[#allocation2 + $0x460] sm:$0xff]  }
  0xc0   :  { %v6087_v49 = vld [vmem:[#allocation2 + $0x4e0] sm:$0xff]  }
  0xc1   :  { %5366 = vmatpush3.bf16.msra.mxu0 %v5988_v54  ;;  %v4864_v54 = vcombine.low %v139_v50, %v163_v51 }
  0xc2   :  { %5388 = vmatpush3.bf16.msra.mxu1 %v5989_v55  ;;  %5367 = vmatprep.subr.bf16.mxu0 %v5990_v56  ;;  %v4865_v55 = vcombine.high %v139_v50, %v163_v51  ;;  %v6038_v56 = vld [vmem:[#allocation2 + $0x340] sm:$0xff]  }
  0xc3   :  { %5389 = vmatprep.subr.bf16.mxu1 %v5991_v57  ;;  %v6039_v57 = vld [vmem:[#allocation2 + $0x3c0] sm:$0xff]  }
  0xc4   :  { %v6088_v50 = vld [vmem:[#allocation2 + $0x420] sm:$0xff]  }
  0xc5   :  { %5368 = vmatpush3.bf16.msra.mxu0 %v5992_v58  ;;  %v6040_v58 = vld [vmem:[#allocation2 + $0x300] sm:$0xff]  }
  0xc6   :  { %5390 = vmatpush3.bf16.msra.mxu1 %v5993_v59  ;;  %5369 = vmatprep.subr.bf16.mxu0 %v5994_v60  ;;  %v6041_v59 = vld [vmem:[#allocation2 + $0x380] sm:$0xff]   ;;  %v6042_v60 = vld [vmem:[#allocation2 + $0x348] sm:$0xff]  }
  0xc7   :  { %5391 = vmatprep.subr.bf16.mxu1 %v5995_v61  ;;  %v6043_v61 = vld [vmem:[#allocation2 + $0x3c8] sm:$0xff]   ;;  %v6089_v51 = vld [vmem:[#allocation2 + $0x4a0] sm:$0xff]  }
  0xc9   :  { %5370 = vmatpush3.bf16.msra.mxu0 %v5996_v62  ;;  %v6044_v62 = vld [vmem:[#allocation2 + $0x308] sm:$0xff]  }
  0xca   :  { %5392 = vmatpush3.bf16.msra.mxu1 %v5997_v63  ;;  %5371 = vmatprep.subr.bf16.mxu0 %v5998_v0  ;;  %v6045_v63 = vld [vmem:[#allocation2 + $0x388] sm:$0xff]   ;;  %v6046_v0 = vld [vmem:[#allocation2 + $0x350] sm:$0xff]  }
  0xcb   :  { %5393 = vmatprep.subr.bf16.mxu1 %v5999_v1  ;;  %v6047_v1 = vld [vmem:[#allocation2 + $0x3d0] sm:$0xff]  }
  0xcd   :  { %5372 = vmatpush3.bf16.msra.mxu0 %v6000_v2  ;;  %v6048_v2 = vld [vmem:[#allocation2 + $0x310] sm:$0xff]  }
  0xce   :  { %5394 = vmatpush3.bf16.msra.mxu1 %v6001_v3  ;;  %5373 = vmatprep.subr.bf16.mxu0 %v6002_v4  ;;  %v6049_v3 = vld [vmem:[#allocation2 + $0x390] sm:$0xff]   ;;  %v6050_v4 = vld [vmem:[#allocation2 + $0x358] sm:$0xff]  }
  0xcf   :  { %5395 = vmatprep.subr.bf16.mxu1 %v6003_v5  ;;  %v6051_v5 = vld [vmem:[#allocation2 + $0x3d8] sm:$0xff]  }
  0xd1   :  { %5374 = vmatpush3.bf16.msra.mxu0 %v6004_v6  ;;  %v6052_v6 = vld [vmem:[#allocation2 + $0x318] sm:$0xff]  }
  0xd2   :  { %5396 = vmatpush3.bf16.msra.mxu1 %v6005_v7  ;;  %5403 = vmatprep.subr.bf16.mxu0 %v6006_v16  ;;  %v6053_v7 = vld [vmem:[#allocation2 + $0x398] sm:$0xff]   ;;  %v6062_v16 = vld [vmem:[#allocation2 + $0x370] sm:$0xff]  }
  0xd3   :  { %5425 = vmatprep.subr.bf16.mxu1 %v6007_v17  ;;  %v6063_v17 = vld [vmem:[#allocation2 + $0x3f0] sm:$0xff]  }
  0xd4   :  { %3616 = vmatmul.mubr.bf16.vlgmr.msra.gmra.mrb[4].mxu0 %v4858_v10  ;;  %v6056_v10 = vld [vmem:[#allocation2 + $0x320] sm:$0xff]  }
  0xd5   :  { %3657 = vmatmul.mubr.bf16.vlgmr.msra.gmra.mrb[4].mxu1 %v4860_v14  ;;  %5404 = vmatpush3.bf16.msra.mxu0 %v6008_v18  ;;  %v6060_v14 = vld [vmem:[#allocation2 + $0x328] sm:$0xff]   ;;  %v6064_v18 = vld [vmem:[#allocation2 + $0x330] sm:$0xff]  }
  0xd6   :  { %5426 = vmatpush3.bf16.msra.mxu1 %v6009_v19  ;;  %5405 = vmatprep.subr.bf16.mxu0 %v6010_v20  ;;  %v6065_v19 = vld [vmem:[#allocation2 + $0x3b0] sm:$0xff]   ;;  %v6066_v20 = vld [vmem:[#allocation2 + $0x378] sm:$0xff]  }
  0xd7   :  { %5427 = vmatprep.subr.bf16.mxu1 %v6011_v21  ;;  %3697 = vmatprep.mubr.bf16.mxu0 %v4863_v53  ;;  %v6067_v21 = vld [vmem:[#allocation2 + $0x3f8] sm:$0xff]   ;;  %v6091_v53 = vld [vmem:[#allocation2 + $0x4e8] sm:$0xff]  }
  0xd8   :  { %3738 = vmatprep.mubr.bf16.mxu1 %v4865_v55  ;;  %v6093_v55 = vld [vmem:[#allocation2 + $0x4a8] sm:$0xff]  }
  0xd9   :  { %5406 = vmatpush3.bf16.msra.mxu0 %v6012_v22  ;;  %v6068_v22 = vld [vmem:[#allocation2 + $0x338] sm:$0xff]  }
  0xda   :  { %5428 = vmatpush3.bf16.msra.mxu1 %v6013_v23  ;;  %5407 = vmatprep.subr.bf16.mxu0 %v6014_v24  ;;  %v6069_v23 = vld [vmem:[#allocation2 + $0x3b8] sm:$0xff]   ;;  %v140_v24 = vld [vmem:[%s6932_s0 + $0x30] sm:$0xff] }
  0xdb   :  { %5429 = vmatprep.subr.bf16.mxu1 %v6015_v25  ;;  %v164_v25 = vld [vmem:[%s6932_s0 + $0xf0] sm:$0xff] }
  0xdd   :  { %5408 = vmatpush3.bf16.msra.mxu0 %v6016_v26  ;;  %v141_v26 = vld [vmem:[%s6932_s0 + $0x38] sm:$0xff] }
  0xde   :  { %5430 = vmatpush3.bf16.msra.mxu1 %v6017_v27  ;;  %5409 = vmatprep.subr.bf16.mxu0 %v6018_v28  ;;  %v4866_v27 = vcombine.low %v140_v24, %v164_v25  ;;  %v4867_v28 = vcombine.high %v140_v24, %v164_v25  ;;  %v6118_v24 = vld [vmem:[#allocation2 + $0x560] sm:$0xff]  }
  0xdf   :  { %5431 = vmatprep.subr.bf16.mxu1 %v6019_v29  ;;  %v165_v29 = vld [vmem:[%s6932_s0 + $0xf8] sm:$0xff]  ;;  %v6119_v25 = vld [vmem:[#allocation2 + $0x5e0] sm:$0xff]  }
  0xe1   :  { %5410 = vmatpush3.bf16.msra.mxu0 %v6020_v30  ;;  %v4868_v30 = vcombine.low %v141_v26, %v165_v29 }
  0xe2   :  { %5432 = vmatpush3.bf16.msra.mxu1 %v6021_v31  ;;  %5411 = vmatprep.subr.bf16.mxu0 %v6022_v32  ;;  %v4869_v31 = vcombine.high %v141_v26, %v165_v29  ;;  %v6070_v32 = vld [vmem:[#allocation2 + $0x440] sm:$0xff]   ;;  %v6123_v29 = vld [vmem:[#allocation2 + $0x5e8] sm:$0xff]  }
  0xe3   :  { %5433 = vmatprep.subr.bf16.mxu1 %v6023_v33  ;;  %v6071_v33 = vld [vmem:[#allocation2 + $0x4c0] sm:$0xff]  }
  0xe4   :  { %v6120_v26 = vld [vmem:[#allocation2 + $0x520] sm:$0xff]  }
  0xe5   :  { %5412 = vmatpush3.bf16.msra.mxu0 %v6024_v34  ;;  %v6072_v34 = vld [vmem:[#allocation2 + $0x400] sm:$0xff]  }
  0xe6   :  { %5434 = vmatpush3.bf16.msra.mxu1 %v6025_v35  ;;  %5413 = vmatprep.subr.bf16.mxu0 %v6026_v36  ;;  %v6073_v35 = vld [vmem:[#allocation2 + $0x480] sm:$0xff]   ;;  %v6074_v36 = vld [vmem:[#allocation2 + $0x448] sm:$0xff]  }
  0xe7   :  { %5435 = vmatprep.subr.bf16.mxu1 %v6027_v37  ;;  %v6075_v37 = vld [vmem:[#allocation2 + $0x4c8] sm:$0xff]  }
  0xe9   :  { %5414 = vmatpush3.bf16.msra.mxu0 %v6028_v38  ;;  %v6076_v38 = vld [vmem:[#allocation2 + $0x408] sm:$0xff]  }
  0xea   :  { %5436 = vmatpush3.bf16.msra.mxu1 %v6029_v39  ;;  %5415 = vmatprep.subr.bf16.mxu0 %v6030_v40  ;;  %v6077_v39 = vld [vmem:[#allocation2 + $0x488] sm:$0xff]   ;;  %v6078_v40 = vld [vmem:[#allocation2 + $0x450] sm:$0xff]  }
  0xeb   :  { %5437 = vmatprep.subr.bf16.mxu1 %v6031_v41  ;;  %v6079_v41 = vld [vmem:[#allocation2 + $0x4d0] sm:$0xff]  }
  0xed   :  { %5416 = vmatpush3.bf16.msra.mxu0 %v6032_v42  ;;  %v6080_v42 = vld [vmem:[#allocation2 + $0x410] sm:$0xff]  }
  0xee   :  { %5438 = vmatpush3.bf16.msra.mxu1 %v6033_v43  ;;  %5417 = vmatprep.subr.bf16.mxu0 %v6034_v44  ;;  %v6081_v43 = vld [vmem:[#allocation2 + $0x490] sm:$0xff]   ;;  %v6082_v44 = vld [vmem:[#allocation2 + $0x458] sm:$0xff]  }
  0xef   :  { %5439 = vmatprep.subr.bf16.mxu1 %v6035_v45  ;;  %v6083_v45 = vld [vmem:[#allocation2 + $0x4d8] sm:$0xff]  }
  0xf1   :  { %5418 = vmatpush3.bf16.msra.mxu0 %v6036_v46  ;;  %v6084_v46 = vld [vmem:[#allocation2 + $0x418] sm:$0xff]  }
  0xf2   :  { %5440 = vmatpush3.bf16.msra.mxu1 %v6037_v47  ;;  %5447 = vmatprep.subr.bf16.mxu0 %v6038_v56  ;;  %v6085_v47 = vld [vmem:[#allocation2 + $0x498] sm:$0xff]   ;;  %v6094_v56 = vld [vmem:[#allocation2 + $0x470] sm:$0xff]  }
  0xf3   :  { %5469 = vmatprep.subr.bf16.mxu1 %v6039_v57  ;;  %v6095_v57 = vld [vmem:[#allocation2 + $0x4f0] sm:$0xff]  }
  0xf4   :  { %3698 = vmatmul.mubr.bf16.vlgmr.msra.gmra.mrb[8].mxu0 %v4862_v52  ;;  %v6090_v52 = vld [vmem:[#allocation2 + $0x468] sm:$0xff]  }
  0xf5   :  { %3739 = vmatmul.mubr.bf16.vlgmr.msra.gmra.mrb[8].mxu1 %v4864_v54  ;;  %5448 = vmatpush3.bf16.msra.mxu0 %v6040_v58  ;;  %v6092_v54 = vld [vmem:[#allocation2 + $0x428] sm:$0xff]   ;;  %v6096_v58 = vld [vmem:[#allocation2 + $0x430] sm:$0xff]  }
  0xf6   :  { %5470 = vmatpush3.bf16.msra.mxu1 %v6041_v59  ;;  %5449 = vmatprep.subr.bf16.mxu0 %v6042_v60  ;;  %v6097_v59 = vld [vmem:[#allocation2 + $0x4b0] sm:$0xff]   ;;  %v6098_v60 = vld [vmem:[#allocation2 + $0x478] sm:$0xff]  }
  0xf7   :  { %5471 = vmatprep.subr.bf16.mxu1 %v6043_v61  ;;  %3779 = vmatprep.mubr.bf16.mxu0 %v4867_v28  ;;  %v6099_v61 = vld [vmem:[#allocation2 + $0x4f8] sm:$0xff]   ;;  %v6122_v28 = vld [vmem:[#allocation2 + $0x568] sm:$0xff]  }
  0xf8   :  { %3820 = vmatprep.mubr.bf16.mxu1 %v4869_v31  ;;  %v6125_v31 = vld [vmem:[#allocation2 + $0x5a8] sm:$0xff]  }
  0xf9   :  { %5450 = vmatpush3.bf16.msra.mxu0 %v6044_v62  ;;  %v6100_v62 = vld [vmem:[#allocation2 + $0x438] sm:$0xff]  }
  0xfa   :  { %5472 = vmatpush3.bf16.msra.mxu1 %v6045_v63  ;;  %5451 = vmatprep.subr.bf16.mxu0 %v6046_v0  ;;  %v6101_v63 = vld [vmem:[#allocation2 + $0x4b8] sm:$0xff]   ;;  %v142_v0 = vld [vmem:[%s6932_s0 + $0x40] sm:$0xff] }
  0xfb   :  { %5473 = vmatprep.subr.bf16.mxu1 %v6047_v1  ;;  %v166_v1 = vld [vmem:[%s6932_s0 + $0x100] sm:$0xff] }
  0xfd   :  { %5452 = vmatpush3.bf16.msra.mxu0 %v6048_v2  ;;  %v4870_v2 = vcombine.low %v142_v0, %v166_v1 }
  0xfe   :  { %5474 = vmatpush3.bf16.msra.mxu1 %v6049_v3  ;;  %5453 = vmatprep.subr.bf16.mxu0 %v6050_v4  ;;  %v4871_v3 = vcombine.high %v142_v0, %v166_v1  ;;  %v143_v4 = vld [vmem:[%s6932_s0 + $0x48] sm:$0xff]  ;;  %v6150_v0 = vld [vmem:[#allocation2 + $0x660] sm:$0xff]  }
  0xff   :  { %5475 = vmatprep.subr.bf16.mxu1 %v6051_v5  ;;  %v167_v5 = vld [vmem:[%s6932_s0 + $0x108] sm:$0xff]  ;;  %v6151_v1 = vld [vmem:[#allocation2 + $0x6e0] sm:$0xff]  }
 0x101   :  { %5454 = vmatpush3.bf16.msra.mxu0 %v6052_v6  ;;  %v4872_v6 = vcombine.low %v143_v4, %v167_v5 }
 0x102   :  { %5476 = vmatpush3.bf16.msra.mxu1 %v6053_v7  ;;  %5455 = vmatprep.subr.bf16.mxu0 %v6054_v8  ;;  %v4873_v7 = vcombine.high %v143_v4, %v167_v5  ;;  %v6102_v8 = vld [vmem:[#allocation2 + $0x540] sm:$0xff]   ;;  %v6154_v4 = vld [vmem:[#allocation2 + $0x668] sm:$0xff]  }
 0x103   :  { %5477 = vmatprep.subr.bf16.mxu1 %v6055_v9  ;;  %v6103_v9 = vld [vmem:[#allocation2 + $0x5c0] sm:$0xff]   ;;  %v6155_v5 = vld [vmem:[#allocation2 + $0x6e8] sm:$0xff]  }
 0x105   :  { %5456 = vmatpush3.bf16.msra.mxu0 %v6056_v10  ;;  %v6104_v10 = vld [vmem:[#allocation2 + $0x500] sm:$0xff]  }
 0x106   :  { %5478 = vmatpush3.bf16.msra.mxu1 %v6057_v11  ;;  %5457 = vmatprep.subr.bf16.mxu0 %v6058_v12  ;;  %v6105_v11 = vld [vmem:[#allocation2 + $0x580] sm:$0xff]   ;;  %v6106_v12 = vld [vmem:[#allocation2 + $0x548] sm:$0xff]  }
 0x107   :  { %5479 = vmatprep.subr.bf16.mxu1 %v6059_v13  ;;  %v6107_v13 = vld [vmem:[#allocation2 + $0x5c8] sm:$0xff]  }
 0x109   :  { %5458 = vmatpush3.bf16.msra.mxu0 %v6060_v14  ;;  %v6108_v14 = vld [vmem:[#allocation2 + $0x508] sm:$0xff]  }
 0x10a   :  { %5480 = vmatpush3.bf16.msra.mxu1 %v6061_v15  ;;  %5459 = vmatprep.subr.bf16.mxu0 %v6062_v16  ;;  %v6109_v15 = vld [vmem:[#allocation2 + $0x588] sm:$0xff]   ;;  %v6110_v16 = vld [vmem:[#allocation2 + $0x550] sm:$0xff]  }
 0x10b   :  { %5481 = vmatprep.subr.bf16.mxu1 %v6063_v17  ;;  %v6111_v17 = vld [vmem:[#allocation2 + $0x5d0] sm:$0xff]  }
 0x10d   :  { %5460 = vmatpush3.bf16.msra.mxu0 %v6064_v18  ;;  %v6112_v18 = vld [vmem:[#allocation2 + $0x510] sm:$0xff]  }
 0x10e   :  { %5482 = vmatpush3.bf16.msra.mxu1 %v6065_v19  ;;  %5461 = vmatprep.subr.bf16.mxu0 %v6066_v20  ;;  %v6113_v19 = vld [vmem:[#allocation2 + $0x590] sm:$0xff]   ;;  %v6114_v20 = vld [vmem:[#allocation2 + $0x558] sm:$0xff]  }
 0x10f   :  { %5483 = vmatprep.subr.bf16.mxu1 %v6067_v21  ;;  %v6115_v21 = vld [vmem:[#allocation2 + $0x5d8] sm:$0xff]  }
 0x111   :  { %5462 = vmatpush3.bf16.msra.mxu0 %v6068_v22  ;;  %v6116_v22 = vld [vmem:[#allocation2 + $0x518] sm:$0xff]  }
 0x112   :  { %5484 = vmatpush3.bf16.msra.mxu1 %v6069_v23  ;;  %5491 = vmatprep.subr.bf16.mxu0 %v6070_v32  ;;  %v6117_v23 = vld [vmem:[#allocation2 + $0x598] sm:$0xff]   ;;  %v6126_v32 = vld [vmem:[#allocation2 + $0x570] sm:$0xff]  }
 0x113   :  { %5513 = vmatprep.subr.bf16.mxu1 %v6071_v33  ;;  %v6127_v33 = vld [vmem:[#allocation2 + $0x5f0] sm:$0xff]  }
 0x114   :  { %3780 = vmatmul.mubr.bf16.vlgmr.msra.gmra.mrb[12].mxu0 %v4866_v27  ;;  %v6121_v27 = vld [vmem:[#allocation2 + $0x5a0] sm:$0xff]  }
 0x115   :  { %3821 = vmatmul.mubr.bf16.vlgmr.msra.gmra.mrb[12].mxu1 %v4868_v30  ;;  %5492 = vmatpush3.bf16.msra.mxu0 %v6072_v34  ;;  %v6124_v30 = vld [vmem:[#allocation2 + $0x528] sm:$0xff]   ;;  %v6128_v34 = vld [vmem:[#allocation2 + $0x530] sm:$0xff]  }
 0x116   :  { %5514 = vmatpush3.bf16.msra.mxu1 %v6073_v35  ;;  %5493 = vmatprep.subr.bf16.mxu0 %v6074_v36  ;;  %v6129_v35 = vld [vmem:[#allocation2 + $0x5b0] sm:$0xff]   ;;  %v6130_v36 = vld [vmem:[#allocation2 + $0x578] sm:$0xff]  }
 0x117   :  { %5515 = vmatprep.subr.bf16.mxu1 %v6075_v37  ;;  %3861 = vmatprep.mubr.bf16.mxu0 %v4871_v3  ;;  %v6131_v37 = vld [vmem:[#allocation2 + $0x5f8] sm:$0xff]   ;;  %v6153_v3 = vld [vmem:[#allocation2 + $0x6a0] sm:$0xff]  }
 0x118   :  { %3902 = vmatprep.mubr.bf16.mxu1 %v4873_v7  ;;  %v6157_v7 = vld [vmem:[#allocation2 + $0x6a8] sm:$0xff]  }
 0x119   :  { %5494 = vmatpush3.bf16.msra.mxu0 %v6076_v38  ;;  %v6132_v38 = vld [vmem:[#allocation2 + $0x538] sm:$0xff]  }
 0x11a   :  { %5516 = vmatpush3.bf16.msra.mxu1 %v6077_v39  ;;  %5495 = vmatprep.subr.bf16.mxu0 %v6078_v40  ;;  %v6133_v39 = vld [vmem:[#allocation2 + $0x5b8] sm:$0xff]   ;;  %v144_v40 = vld [vmem:[%s6932_s0 + $0x50] sm:$0xff] }
 0x11b   :  { %5517 = vmatprep.subr.bf16.mxu1 %v6079_v41  ;;  %v168_v41 = vld [vmem:[%s6932_s0 + $0x110] sm:$0xff] }
 0x11d   :  { %5496 = vmatpush3.bf16.msra.mxu0 %v6080_v42  ;;  %v145_v42 = vld [vmem:[%s6932_s0 + $0x58] sm:$0xff] }
 0x11e   :  { %5518 = vmatpush3.bf16.msra.mxu1 %v6081_v43  ;;  %5497 = vmatprep.subr.bf16.mxu0 %v6082_v44  ;;  %v169_v43 = vld [vmem:[%s6932_s0 + $0x118] sm:$0xff]  ;;  %v4874_v44 = vcombine.low %v144_v40, %v168_v41 }
 0x11f   :  { %5519 = vmatprep.subr.bf16.mxu1 %v6083_v45  ;;  %v4875_v45 = vcombine.high %v144_v40, %v168_v41  ;;  %v6181_v41 = vld [vmem:[#allocation2 + $0x798] sm:$0xff]  }
 0x121   :  { %5498 = vmatpush3.bf16.msra.mxu0 %v6084_v46  ;;  %v4876_v46 = vcombine.low %v145_v42, %v169_v43 }
 0x122   :  { %5520 = vmatpush3.bf16.msra.mxu1 %v6085_v47  ;;  %5499 = vmatprep.subr.bf16.mxu0 %v6086_v48  ;;  %v4877_v47 = vcombine.high %v145_v42, %v169_v43  ;;  %v6134_v48 = vld [vmem:[#allocation2 + $0x640] sm:$0xff]  }
 0x123   :  { %5521 = vmatprep.subr.bf16.mxu1 %v6087_v49  ;;  %v6135_v49 = vld [vmem:[#allocation2 + $0x6c0] sm:$0xff]  }
 0x124   :  { %v6182_v43 = vld [vmem:[#allocation2 + $0x760] sm:$0xff]  }
 0x125   :  { %5500 = vmatpush3.bf16.msra.mxu0 %v6088_v50  ;;  %v6136_v50 = vld [vmem:[#allocation2 + $0x600] sm:$0xff]  }
 0x126   :  { %5522 = vmatpush3.bf16.msra.mxu1 %v6089_v51  ;;  %5501 = vmatprep.subr.bf16.mxu0 %v6090_v52  ;;  %v6137_v51 = vld [vmem:[#allocation2 + $0x680] sm:$0xff]   ;;  %v6138_v52 = vld [vmem:[#allocation2 + $0x648] sm:$0xff]  }
 0x127   :  { %5523 = vmatprep.subr.bf16.mxu1 %v6091_v53  ;;  %v6139_v53 = vld [vmem:[#allocation2 + $0x6c8] sm:$0xff]  }
 0x129   :  { %5502 = vmatpush3.bf16.msra.mxu0 %v6092_v54  ;;  %v6140_v54 = vld [vmem:[#allocation2 + $0x608] sm:$0xff]  }
 0x12a   :  { %5524 = vmatpush3.bf16.msra.mxu1 %v6093_v55  ;;  %5503 = vmatprep.subr.bf16.mxu0 %v6094_v56  ;;  %v6141_v55 = vld [vmem:[#allocation2 + $0x688] sm:$0xff]   ;;  %v6142_v56 = vld [vmem:[#allocation2 + $0x650] sm:$0xff]  }
 0x12b   :  { %5525 = vmatprep.subr.bf16.mxu1 %v6095_v57  ;;  %v6143_v57 = vld [vmem:[#allocation2 + $0x6d0] sm:$0xff]  }
 0x12d   :  { %5504 = vmatpush3.bf16.msra.mxu0 %v6096_v58  ;;  %v6144_v58 = vld [vmem:[#allocation2 + $0x610] sm:$0xff]  }
 0x12e   :  { %5526 = vmatpush3.bf16.msra.mxu1 %v6097_v59  ;;  %5505 = vmatprep.subr.bf16.mxu0 %v6098_v60  ;;  %v6145_v59 = vld [vmem:[#allocation2 + $0x690] sm:$0xff]   ;;  %v6146_v60 = vld [vmem:[#allocation2 + $0x658] sm:$0xff]  }
 0x12f   :  { %5527 = vmatprep.subr.bf16.mxu1 %v6099_v61  ;;  %v6147_v61 = vld [vmem:[#allocation2 + $0x6d8] sm:$0xff]  }
 0x131   :  { %5506 = vmatpush3.bf16.msra.mxu0 %v6100_v62  ;;  %v6148_v62 = vld [vmem:[#allocation2 + $0x618] sm:$0xff]  }
 0x132   :  { %5528 = vmatpush3.bf16.msra.mxu1 %v6101_v63  ;;  %5535 = vmatprep.subr.bf16.mxu0 %v6102_v8  ;;  %v6149_v63 = vld [vmem:[#allocation2 + $0x698] sm:$0xff]   ;;  %v6158_v8 = vld [vmem:[#allocation2 + $0x670] sm:$0xff]  }
 0x133   :  { %5557 = vmatprep.subr.bf16.mxu1 %v6103_v9  ;;  %v6159_v9 = vld [vmem:[#allocation2 + $0x6f0] sm:$0xff]  }
 0x134   :  { %3862 = vmatmul.mubr.bf16.vlgmr.msra.gmra.mrb[16].mxu0 %v4870_v2  ;;  %v6152_v2 = vld [vmem:[#allocation2 + $0x620] sm:$0xff]  }
 0x135   :  { %3903 = vmatmul.mubr.bf16.vlgmr.msra.gmra.mrb[16].mxu1 %v4872_v6  ;;  %5536 = vmatpush3.bf16.msra.mxu0 %v6104_v10  ;;  %v6156_v6 = vld [vmem:[#allocation2 + $0x628] sm:$0xff]   ;;  %v6160_v10 = vld [vmem:[#allocation2 + $0x630] sm:$0xff]  }
 0x136   :  { %5558 = vmatpush3.bf16.msra.mxu1 %v6105_v11  ;;  %5537 = vmatprep.subr.bf16.mxu0 %v6106_v12  ;;  %v6161_v11 = vld [vmem:[#allocation2 + $0x6b0] sm:$0xff]   ;;  %v6162_v12 = vld [vmem:[#allocation2 + $0x678] sm:$0xff]  }
 0x137   :  { %5559 = vmatprep.subr.bf16.mxu1 %v6107_v13  ;;  %3943 = vmatprep.mubr.bf16.mxu0 %v4875_v45  ;;  %v6163_v13 = vld [vmem:[#allocation2 + $0x6f8] sm:$0xff]  }
 0x138   :  { %3984 = vmatprep.mubr.bf16.mxu1 %v4877_v47 }
 0x139   :  { %5538 = vmatpush3.bf16.msra.mxu0 %v6108_v14  ;;  %v6164_v14 = vld [vmem:[#allocation2 + $0x638] sm:$0xff]  }
 0x13a   :  { %5560 = vmatpush3.bf16.msra.mxu1 %v6109_v15  ;;  %5539 = vmatprep.subr.bf16.mxu0 %v6110_v16  ;;  %v6165_v15 = vld [vmem:[#allocation2 + $0x6b8] sm:$0xff]   ;;  %v146_v16 = vld [vmem:[%s6932_s0 + $0x60] sm:$0xff] }
 0x13b   :  { %5561 = vmatprep.subr.bf16.mxu1 %v6111_v17  ;;  %v170_v17 = vld [vmem:[%s6932_s0 + $0x120] sm:$0xff] }
 0x13d   :  { %5540 = vmatpush3.bf16.msra.mxu0 %v6112_v18  ;;  %v147_v18 = vld [vmem:[%s6932_s0 + $0x68] sm:$0xff] }
 0x13e   :  { %5562 = vmatpush3.bf16.msra.mxu1 %v6113_v19  ;;  %5541 = vmatprep.subr.bf16.mxu0 %v6114_v20  ;;  %v4878_v19 = vcombine.low %v146_v16, %v170_v17  ;;  %v4879_v20 = vcombine.high %v146_v16, %v170_v17  ;;  %v6198_v17 = vld [vmem:[#allocation2 + $0x840] sm:$0xff]  }
 0x13f   :  { %5563 = vmatprep.subr.bf16.mxu1 %v6115_v21  ;;  %v171_v21 = vld [vmem:[%s6932_s0 + $0x128] sm:$0xff] }
 0x141   :  { %5542 = vmatpush3.bf16.msra.mxu0 %v6116_v22  ;;  %v4880_v22 = vcombine.low %v147_v18, %v171_v21 }
 0x142   :  { %5564 = vmatpush3.bf16.msra.mxu1 %v6117_v23  ;;  %5543 = vmatprep.subr.bf16.mxu0 %v6118_v24  ;;  %v4881_v23 = vcombine.high %v147_v18, %v171_v21  ;;  %v6166_v24 = vld [vmem:[#allocation2 + $0x740] sm:$0xff]   ;;  %v6202_v21 = vld [vmem:[#allocation2 + $0x848] sm:$0xff]  }
 0x143   :  { %5565 = vmatprep.subr.bf16.mxu1 %v6119_v25  ;;  %v6167_v25 = vld [vmem:[#allocation2 + $0x7c0] sm:$0xff]  }
 0x144   :  { %v6199_v18 = vld [vmem:[#allocation2 + $0x8c0] sm:$0xff]  }
 0x145   :  { %5544 = vmatpush3.bf16.msra.mxu0 %v6120_v26  ;;  %v6168_v26 = vld [vmem:[#allocation2 + $0x700] sm:$0xff]  }
 0x146   :  { %5566 = vmatpush3.bf16.msra.mxu1 %v6121_v27  ;;  %5545 = vmatprep.subr.bf16.mxu0 %v6122_v28  ;;  %v6169_v27 = vld [vmem:[#allocation2 + $0x780] sm:$0xff]   ;;  %v6170_v28 = vld [vmem:[#allocation2 + $0x748] sm:$0xff]  }
 0x147   :  { %5567 = vmatprep.subr.bf16.mxu1 %v6123_v29  ;;  %v6171_v29 = vld [vmem:[#allocation2 + $0x7c8] sm:$0xff]  }
 0x149   :  { %5546 = vmatpush3.bf16.msra.mxu0 %v6124_v30  ;;  %v6172_v30 = vld [vmem:[#allocation2 + $0x708] sm:$0xff]  }
 0x14a   :  { %5568 = vmatpush3.bf16.msra.mxu1 %v6125_v31  ;;  %5547 = vmatprep.subr.bf16.mxu0 %v6126_v32  ;;  %v6173_v31 = vld [vmem:[#allocation2 + $0x788] sm:$0xff]   ;;  %v6174_v32 = vld [vmem:[#allocation2 + $0x750] sm:$0xff]  }
 0x14b   :  { %5569 = vmatprep.subr.bf16.mxu1 %v6127_v33  ;;  %v6175_v33 = vld [vmem:[#allocation2 + $0x7d0] sm:$0xff]  }
 0x14d   :  { %5548 = vmatpush3.bf16.msra.mxu0 %v6128_v34  ;;  %v6176_v34 = vld [vmem:[#allocation2 + $0x710] sm:$0xff]  }
 0x14e   :  { %5570 = vmatpush3.bf16.msra.mxu1 %v6129_v35  ;;  %5549 = vmatprep.subr.bf16.mxu0 %v6130_v36  ;;  %v6177_v35 = vld [vmem:[#allocation2 + $0x790] sm:$0xff]   ;;  %v6178_v36 = vld [vmem:[#allocation2 + $0x758] sm:$0xff]  }
 0x14f   :  { %5571 = vmatprep.subr.bf16.mxu1 %v6131_v37  ;;  %v6179_v37 = vld [vmem:[#allocation2 + $0x7d8] sm:$0xff]  }
 0x151   :  { %5550 = vmatpush3.bf16.msra.mxu0 %v6132_v38 }
 0x152   :  { %5572 = vmatpush3.bf16.msra.mxu1 %v6133_v39  ;;  %5579 = vmatprep.subr.bf16.mxu0 %v6134_v48  ;;  %v6180_v39 = vld [vmem:[#allocation2 + $0x718] sm:$0xff]  }
 0x153   :  { %5601 = vmatprep.subr.bf16.mxu1 %v6135_v49  ;;  %v6184_v49 = vld [vmem:[#allocation2 + $0x720] sm:$0xff]  }
 0x154   :  { %3944 = vmatmul.mubr.bf16.vlgmr.msra.gmra.mrb[20].mxu0 %v4874_v44 }
 0x155   :  { %3985 = vmatmul.mubr.bf16.vlgmr.msra.gmra.mrb[20].mxu1 %v4876_v46  ;;  %5580 = vmatpush3.bf16.msra.mxu0 %v6136_v50  ;;  %v6183_v46 = vld [vmem:[#allocation2 + $0x7e0] sm:$0xff]  }
 0x156   :  { %5602 = vmatpush3.bf16.msra.mxu1 %v6137_v51  ;;  %5581 = vmatprep.subr.bf16.mxu0 %v6138_v52  ;;  %v6185_v51 = vld [vmem:[#allocation2 + $0x7a0] sm:$0xff]  }
 0x157   :  { %5603 = vmatprep.subr.bf16.mxu1 %v6139_v53  ;;  %4025 = vmatprep.mubr.bf16.mxu0 %v4879_v20  ;;  %v4853_v52 = vld [vmem:[#allocation4] ss:$0 sm:$0xff] }
 0x158   :  { %4066 = vmatprep.mubr.bf16.mxu1 %v4881_v23  ;;  %v6201_v20 = vld [vmem:[#allocation2 + $0x880] sm:$0xff]   ;;  %v6204_v23 = vld [vmem:[#allocation2 + $0x808] sm:$0xff]  }
 0x159   :  { %5582 = vmatpush3.bf16.msra.mxu0 %v6140_v54 }
 0x15a   :  { %5604 = vmatpush3.bf16.msra.mxu1 %v6141_v55  ;;  %5583 = vmatprep.subr.bf16.mxu0 %v6142_v56  ;;  %v6186_v55 = vld [vmem:[#allocation2 + $0x768] sm:$0xff]  }
 0x15b   :  { %5605 = vmatprep.subr.bf16.mxu1 %v6143_v57 }
 0x15d   :  { %5584 = vmatpush3.bf16.msra.mxu0 %v6144_v58  ;;  %v6187_v58 = vld [vmem:[#allocation2 + $0x7e8] sm:$0xff]  }
 0x15e   :  { %5606 = vmatpush3.bf16.msra.mxu1 %v6145_v59  ;;  %5585 = vmatprep.subr.bf16.mxu0 %v6146_v60 }
 0x15f   :  { %5607 = vmatprep.subr.bf16.mxu1 %v6147_v61  ;;  %v6188_v61 = vld [vmem:[#allocation2 + $0x728] sm:$0xff]  }
 0x161   :  { %5586 = vmatpush3.bf16.msra.mxu0 %v6148_v62 }
 0x162   :  { %5608 = vmatpush3.bf16.msra.mxu1 %v6149_v63  ;;  %5587 = vmatprep.subr.bf16.mxu0 %v6150_v0  ;;  %v6189_v63 = vld [vmem:[#allocation2 + $0x7a8] sm:$0xff]  }
 0x163   :  { %5609 = vmatprep.subr.bf16.mxu1 %v6151_v1  ;;  %v6190_v1 = vld [vmem:[#allocation2 + $0x770] sm:$0xff]  }
 0x165   :  { %5588 = vmatpush3.bf16.msra.mxu0 %v6152_v2  ;;  %v6191_v2 = vld [vmem:[#allocation2 + $0x7f0] sm:$0xff]  }
 0x166   :  { %5610 = vmatpush3.bf16.msra.mxu1 %v6153_v3  ;;  %5589 = vmatprep.subr.bf16.mxu0 %v6154_v4  ;;  %v6192_v3 = vld [vmem:[#allocation2 + $0x730] sm:$0xff]  }
 0x167   :  { %5611 = vmatprep.subr.bf16.mxu1 %v6155_v5  ;;  %v6193_v4 = vld [vmem:[#allocation2 + $0x7b0] sm:$0xff]   ;;  %v6194_v5 = vld [vmem:[#allocation2 + $0x778] sm:$0xff]  }
 0x169   :  { %5590 = vmatpush3.bf16.msra.mxu0 %v6156_v6  ;;  %v6195_v6 = vld [vmem:[#allocation2 + $0x7f8] sm:$0xff]  }
 0x16a   :  { %5612 = vmatpush3.bf16.msra.mxu1 %v6157_v7  ;;  %5591 = vmatprep.subr.bf16.mxu0 %v6158_v8  ;;  %v6196_v7 = vld [vmem:[#allocation2 + $0x738] sm:$0xff]  }
 0x16b   :  { %5613 = vmatprep.subr.bf16.mxu1 %v6159_v9  ;;  %v6197_v8 = vld [vmem:[#allocation2 + $0x7b8] sm:$0xff]   ;;  %v148_v9 = vld [vmem:[%s6932_s0 + $0x70] sm:$0xff] }
 0x16d   :  { %5592 = vmatpush3.bf16.msra.mxu0 %v6160_v10  ;;  %v172_v10 = vld [vmem:[%s6932_s0 + $0x130] sm:$0xff] }
 0x16e   :  { %5614 = vmatpush3.bf16.msra.mxu1 %v6161_v11  ;;  %5593 = vmatprep.subr.bf16.mxu0 %v6162_v12  ;;  %v149_v11 = vld [vmem:[%s6932_s0 + $0x78] sm:$0xff] }
 0x16f   :  { %5615 = vmatprep.subr.bf16.mxu1 %v6163_v13  ;;  %v173_v12 = vld [vmem:[%s6932_s0 + $0x138] sm:$0xff]  ;;  %v4882_v13 = vcombine.low %v148_v9, %v172_v10 }
 0x170   :  { %v4885_v16 = vcombine.high %v149_v11, %v173_v12 }
 0x171   :  { %5594 = vmatpush3.bf16.msra.mxu0 %v6164_v14  ;;  %v4883_v14 = vcombine.high %v148_v9, %v172_v10  ;;  %v6230_v9 = vld [vmem:[#allocation2 + $0x940] sm:$0xff]  }
 0x172   :  { %5616 = vmatpush3.bf16.msra.mxu1 %v6165_v15  ;;  %5623 = vmatprep.subr.bf16.mxu0 %v6166_v24  ;;  %v4884_v15 = vcombine.low %v149_v11, %v173_v12  ;;  %v6205_v24 = vld [vmem:[#allocation2 + $0x888] sm:$0xff]   ;;  %v6231_v10 = vld [vmem:[#allocation2 + $0x9c0] sm:$0xff]  }
 0x173   :  { %5645 = vmatprep.subr.bf16.mxu1 %v6167_v25  ;;  %v6206_v25 = vld [vmem:[#allocation2 + $0x850] sm:$0xff]   ;;  %v6232_v11 = vld [vmem:[#allocation2 + $0x900] sm:$0xff]  }
 0x174   :  { %4026 = vmatmul.mubr.bf16.vlgmr.msra.gmra.mrb[24].mxu0 %v4878_v19  ;;  %v6200_v19 = vld [vmem:[#allocation2 + $0x800] sm:$0xff]  }
 0x175   :  { %4067 = vmatmul.mubr.bf16.vlgmr.msra.gmra.mrb[24].mxu1 %v4880_v22  ;;  %5624 = vmatpush3.bf16.msra.mxu0 %v6168_v26  ;;  %v6203_v22 = vld [vmem:[#allocation2 + $0x8c8] sm:$0xff]   ;;  %v6207_v26 = vld [vmem:[#allocation2 + $0x8d0] sm:$0xff]   ;;  %v6233_v12 = vld [vmem:[#allocation2 + $0x980] sm:$0xff]  }
 0x176   :  { %5646 = vmatpush3.bf16.msra.mxu1 %v6169_v27  ;;  %5625 = vmatprep.subr.bf16.mxu0 %v6170_v28  ;;  %v6208_v27 = vld [vmem:[#allocation2 + $0x810] sm:$0xff]  }
 0x177   :  { %5647 = vmatprep.subr.bf16.mxu1 %v6171_v29  ;;  %4107 = vmatprep.mubr.bf16.mxu0 %v4883_v14  ;;  %v6209_v28 = vld [vmem:[#allocation2 + $0x890] sm:$0xff]   ;;  %v6210_v29 = vld [vmem:[#allocation2 + $0x858] sm:$0xff]   ;;  %v6235_v14 = vld [vmem:[#allocation2 + $0x9c8] sm:$0xff]  }
 0x178   :  { %4148 = vmatprep.mubr.bf16.mxu1 %v4885_v16  ;;  %v6237_v16 = vld [vmem:[#allocation2 + $0x988] sm:$0xff]  }
 0x179   :  { %5626 = vmatpush3.bf16.msra.mxu0 %v6172_v30  ;;  %v6211_v30 = vld [vmem:[#allocation2 + $0x8d8] sm:$0xff]  }
 0x17a   :  { %5648 = vmatpush3.bf16.msra.mxu1 %v6173_v31  ;;  %5627 = vmatprep.subr.bf16.mxu0 %v6174_v32  ;;  %v6212_v32 = vld [vmem:[#allocation2 + $0x818] sm:$0xff]  }
 0x17b   :  { %5649 = vmatprep.subr.bf16.mxu1 %v6175_v33 }
 0x17d   :  { %5628 = vmatpush3.bf16.msra.mxu0 %v6176_v34  ;;  %v6213_v34 = vld [vmem:[#allocation2 + $0x898] sm:$0xff]  }
 0x17e   :  { %5650 = vmatpush3.bf16.msra.mxu1 %v6177_v35  ;;  %5629 = vmatprep.subr.bf16.mxu0 %v6178_v36  ;;  %v6214_v36 = vld [vmem:[#allocation2 + $0x860] sm:$0xff]  }
 0x17f   :  { %5651 = vmatprep.subr.bf16.mxu1 %v6179_v37 }
 0x181   :  { %5630 = vmatpush3.bf16.msra.mxu0 %v6180_v39  ;;  %v6215_v39 = vld [vmem:[#allocation2 + $0x8e0] sm:$0xff]  }
 0x182   :  { %5652 = vmatpush3.bf16.msra.mxu1 %v6181_v41  ;;  %5631 = vmatprep.subr.bf16.mxu0 %v6182_v43 }
 0x183   :  { %5653 = vmatprep.subr.bf16.mxu1 %v6183_v46 }
 0x185   :  { %5632 = vmatpush3.bf16.msra.mxu0 %v6184_v49 }
 0x186   :  { %5654 = vmatpush3.bf16.msra.mxu1 %v6185_v51  ;;  %5633 = vmatprep.subr.bf16.mxu0 %v6186_v55  ;;  %v6219_v51 = vld [vmem:[#allocation2 + $0x8e8] sm:$0xff]  }
 0x187   :  { %v5331_v38 = vpop.f32.mrb[0].mxu0  ;;  %5655 = vmatprep.subr.bf16.mxu1 %v6187_v58  ;;  %v6221_v55 = vld [vmem:[#allocation2 + $0x8a8] sm:$0xff]   ;;  %v6223_v58 = vld [vmem:[#allocation2 + $0x8f0] sm:$0xff]  }
 0x188   :  { %v5353_v40 = vpop.f32.mrb[0].mxu1  ;;  %v5332_v42 = vpop.f32.mrb[1].mxu0 }
 0x189   :  { %v5333_v44 = vadd.f32 %v5332_v42, %v5331_v38  ;;  %v5354_v45 = vpop.f32.mrb[1].mxu1  ;;  %v5334_v48 = vpop.f32.mrb[2].mxu0  ;;  %5634 = vmatpush3.bf16.msra.mxu0 %v6188_v61  ;;  %v6216_v42 = vld [vmem:[#allocation2 + $0x820] sm:$0xff]   ;;  %v6226_v61 = vld [vmem:[#allocation2 + $0x878] sm:$0xff]  }
 0x18a   :  { %v5355_v47 = vadd.f32 %v5354_v45, %v5353_v40  ;;  %v5356_v50 = vpop.f32.mrb[2].mxu1  ;;  %v5335_v53 = vpop.f32.mrb[3].mxu0  ;;  %5656 = vmatpush3.bf16.msra.mxu1 %v6189_v63  ;;  %5635 = vmatprep.subr.bf16.mxu0 %v6190_v1  ;;  %v6217_v45 = vld [vmem:[#allocation2 + $0x8a0] sm:$0xff]   ;;  %v6228_v63 = vld [vmem:[#allocation2 + $0x838] sm:$0xff]  }
 0x18b   :  { %v3536_v54 = vadd.f32 %v5333_v44, %v4853_v52  ;;  %v5336_v56 = vadd.f32 %v5335_v53, %v5334_v48  ;;  %v5357_v57 = vpop.f32.mrb[3].mxu1  ;;  %5657 = vmatprep.subr.bf16.mxu1 %v6191_v2  ;;  %v6218_v48 = vld [vmem:[#allocation2 + $0x868] sm:$0xff]   ;;  %v150_v1 = vld [vmem:[%s6932_s0 + $0x80] sm:$0xff] }
 0x18c   :  { %v5358_v59 = vadd.f32 %v5357_v57, %v5356_v50  ;;  %v6220_v53 = vld [vmem:[#allocation2 + $0x828] sm:$0xff]   ;;  %v6222_v57 = vld [vmem:[#allocation2 + $0x870] sm:$0xff]   ;;  %v174_v2 = vld [vmem:[%s6932_s0 + $0x140] sm:$0xff] }
 0x18d   :  { %v6812_v60 = vadd.f32 %v5355_v47, %v3536_v54  ;;  %v3539_v62 = vadd.f32 %v5336_v56, %v4853_v52  ;;  %5636 = vmatpush3.bf16.msra.mxu0 %v6192_v3  ;;  %v151_v3 = vld [vmem:[%s6932_s0 + $0x88] sm:$0xff] }
 0x18e   :  { %5658 = vmatpush3.bf16.msra.mxu1 %v6193_v4  ;;  %5637 = vmatprep.subr.bf16.mxu0 %v6194_v5  ;;  %v4886_v4 = vcombine.low %v150_v1, %v174_v2  ;;  %v4887_v5 = vcombine.high %v150_v1, %v174_v2  ;;  %v6262_v1 = vld [vmem:[#allocation2 + $0xa40] sm:$0xff]  }
 0x18f   :  { %v6814_v0 = vadd.f32 %v5358_v59, %v3539_v62  ;;  %5659 = vmatprep.subr.bf16.mxu1 %v6195_v6  ;;  %v6224_v59 = vld [vmem:[#allocation2 + $0x830] sm:$0xff]   ;;  %v6227_v62 = vld [vmem:[#allocation2 + $0x8f8] sm:$0xff]   ;;  %v175_v6 = vld [vmem:[%s6932_s0 + $0x148] sm:$0xff] }
 0x190   :  { %v6263_v2 = vld [vmem:[#allocation2 + $0xac0] sm:$0xff]  }
 0x191   :  { %5638 = vmatpush3.bf16.msra.mxu0 %v6196_v7  ;;  %v4888_v7 = vcombine.low %v151_v3, %v175_v6 }
 0x192   :  { %5660 = vmatpush3.bf16.msra.mxu1 %v6197_v8  ;;  %5667 = vmatprep.subr.bf16.mxu0 %v6198_v17  ;;  %v4889_v8 = vcombine.high %v151_v3, %v175_v6  ;;  %v6238_v17 = vld [vmem:[#allocation2 + $0x950] sm:$0xff]   ;;  %v6264_v3 = vld [vmem:[#allocation2 + $0xa00] sm:$0xff]   ;;  %v6267_v6 = vld [vmem:[#allocation2 + $0xac8] sm:$0xff]  }
 0x193   :  { %5689 = vmatprep.subr.bf16.mxu1 %v6199_v18  ;;  %v6239_v18 = vld [vmem:[#allocation2 + $0x9d0] sm:$0xff]  }
 0x194   :  { %4108 = vmatmul.mubr.bf16.vlgmr.msra.gmra.mrb[28].mxu0 %v4882_v13  ;;  %v6234_v13 = vld [vmem:[#allocation2 + $0x948] sm:$0xff]  }
 0x195   :  { %4149 = vmatmul.mubr.bf16.vlgmr.msra.gmra.mrb[28].mxu1 %v4884_v15  ;;  %5668 = vmatpush3.bf16.msra.mxu0 %v6200_v19  ;;  %v6236_v15 = vld [vmem:[#allocation2 + $0x908] sm:$0xff]   ;;  %v6240_v19 = vld [vmem:[#allocation2 + $0x910] sm:$0xff]  }
 0x196   :  { %5690 = vmatpush3.bf16.msra.mxu1 %v6201_v20  ;;  %5669 = vmatprep.subr.bf16.mxu0 %v6202_v21  ;;  %v6241_v20 = vld [vmem:[#allocation2 + $0x990] sm:$0xff]   ;;  %v6242_v21 = vld [vmem:[#allocation2 + $0x958] sm:$0xff]  }
 0x197   :  { %5691 = vmatprep.subr.bf16.mxu1 %v6203_v22  ;;  %4189 = vmatprep.mubr.bf16.mxu0 %v4887_v5  ;;  %v6243_v22 = vld [vmem:[#allocation2 + $0x9d8] sm:$0xff]   ;;  %v6266_v5 = vld [vmem:[#allocation2 + $0xa48] sm:$0xff]  }
 0x198   :  { %4230 = vmatprep.mubr.bf16.mxu1 %v4889_v8  ;;  %v6269_v8 = vld [vmem:[#allocation2 + $0xa88] sm:$0xff]  }
 0x199   :  { %5670 = vmatpush3.bf16.msra.mxu0 %v6204_v23 }
 0x19a   :  { %5692 = vmatpush3.bf16.msra.mxu1 %v6205_v24  ;;  %5671 = vmatprep.subr.bf16.mxu0 %v6206_v25  ;;  %v6244_v24 = vld [vmem:[#allocation2 + $0x918] sm:$0xff]  }
 0x19b   :  { %5693 = vmatprep.subr.bf16.mxu1 %v6207_v26  ;;  %v6245_v26 = vld [vmem:[#allocation2 + $0x998] sm:$0xff]  }
 0x19d   :  { %5672 = vmatpush3.bf16.msra.mxu0 %v6208_v27 }
 0x19e   :  { %5694 = vmatpush3.bf16.msra.mxu1 %v6209_v28  ;;  %5673 = vmatprep.subr.bf16.mxu0 %v6210_v29  ;;  %v6246_v28 = vld [vmem:[#allocation2 + $0x960] sm:$0xff]  }
 0x19f   :  { %5695 = vmatprep.subr.bf16.mxu1 %v6211_v30 }
 0x1a1   :  { %5674 = vmatpush3.bf16.msra.mxu0 %v6212_v32 }
 0x1a2   :  { %5696 = vmatpush3.bf16.msra.mxu1 %v6213_v34  ;;  %5675 = vmatprep.subr.bf16.mxu0 %v6214_v36  ;;  %v6248_v34 = vld [vmem:[#allocation2 + $0x920] sm:$0xff]  }
 0x1a3   :  { %5697 = vmatprep.subr.bf16.mxu1 %v6215_v39 }
 0x1a5   :  { %5676 = vmatpush3.bf16.msra.mxu0 %v6216_v42 }
 0x1a6   :  { %5698 = vmatpush3.bf16.msra.mxu1 %v6217_v45  ;;  %5677 = vmatprep.subr.bf16.mxu0 %v6218_v48  ;;  %v6252_v45 = vld [vmem:[#allocation2 + $0x928] sm:$0xff]  }
 0x1a7   :  { %v5375_v31 = vpop.f32.mrb[4].mxu0  ;;  %5699 = vmatprep.subr.bf16.mxu1 %v6219_v51  ;;  %v6253_v48 = vld [vmem:[#allocation2 + $0x9a8] sm:$0xff]   ;;  %v6256_v51 = vld [vmem:[#allocation2 + $0x930] sm:$0xff]  }
 0x1a8   :  { %v5397_v33 = vpop.f32.mrb[4].mxu1  ;;  %v5376_v35 = vpop.f32.mrb[5].mxu0 }
 0x1a9   :  { %v5377_v37 = vadd.f32 %v5376_v35, %v5375_v31  ;;  %v5398_v38 = vpop.f32.mrb[5].mxu1  ;;  %v5378_v41 = vpop.f32.mrb[6].mxu0  ;;  %5678 = vmatpush3.bf16.msra.mxu0 %v6220_v53  ;;  %v6247_v31 = vld [vmem:[#allocation2 + $0x9e0] sm:$0xff]   ;;  %v6258_v53 = vld [vmem:[#allocation2 + $0x978] sm:$0xff]  }
 0x1aa   :  { %v5399_v40 = vadd.f32 %v5398_v38, %v5397_v33  ;;  %v5400_v44 = vpop.f32.mrb[6].mxu1  ;;  %v5379_v46 = vpop.f32.mrb[7].mxu0  ;;  %5700 = vmatpush3.bf16.msra.mxu1 %v6221_v55  ;;  %5679 = vmatprep.subr.bf16.mxu0 %v6222_v57  ;;  %v6260_v55 = vld [vmem:[#allocation2 + $0x938] sm:$0xff]   ;;  %v152_v57 = vld [vmem:[%s6932_s0 + $0x90] sm:$0xff] }
 0x1ab   :  { %v3618_v43 = vadd.f32 %v5377_v37, %v6812_v60  ;;  %v5380_v49 = vadd.f32 %v5379_v46, %v5378_v41  ;;  %v5401_v50 = vpop.f32.mrb[7].mxu1  ;;  %5701 = vmatprep.subr.bf16.mxu1 %v6223_v58  ;;  %v6225_v60 = vld [vmem:[#allocation2 + $0x8b0] sm:$0xff]   ;;  %v6249_v37 = vld [vmem:[#allocation2 + $0x9a0] sm:$0xff]  }
 0x1ac   :  { %v5402_v52 = vadd.f32 %v5401_v50, %v5400_v44  ;;  %v6255_v50 = vld [vmem:[#allocation2 + $0x9f0] sm:$0xff]  }
 0x1ad   :  { %v6829_v47 = vadd.f32 %v5399_v40, %v3618_v43  ;;  %v3621_v54 = vadd.f32 %v5380_v49, %v6814_v0  ;;  %5680 = vmatpush3.bf16.msra.mxu0 %v6224_v59  ;;  %v6229_v0 = vld [vmem:[#allocation2 + $0x8b8] sm:$0xff]   ;;  %v6250_v40 = vld [vmem:[#allocation2 + $0x968] sm:$0xff]   ;;  %v6254_v49 = vld [vmem:[#allocation2 + $0x970] sm:$0xff]  }
 0x1ae   :  { %5702 = vmatpush3.bf16.msra.mxu1 %v6225_v60  ;;  %5681 = vmatprep.subr.bf16.mxu0 %v6226_v61  ;;  %v6251_v43 = vld [vmem:[#allocation2 + $0x9e8] sm:$0xff]   ;;  %v176_v58 = vld [vmem:[%s6932_s0 + $0x150] sm:$0xff]  ;;  %v153_v61 = vld [vmem:[%s6932_s0 + $0x98] sm:$0xff] }
 0x1af   :  { %v6832_v56 = vadd.f32 %v5402_v52, %v3621_v54  ;;  %5703 = vmatprep.subr.bf16.mxu1 %v6227_v62  ;;  %v6257_v52 = vld [vmem:[#allocation2 + $0x9b0] sm:$0xff]   ;;  %v6259_v54 = vld [vmem:[#allocation2 + $0x9f8] sm:$0xff]   ;;  %v4890_v59 = vcombine.low %v152_v57, %v176_v58  ;;  %v4891_v60 = vcombine.high %v152_v57, %v176_v58  ;;  %v6294_v57 = vld [vmem:[#allocation2 + $0xb40] sm:$0xff]  }
 0x1b0   :  { %v177_v62 = vld [vmem:[%s6932_s0 + $0x158] sm:$0xff]  ;;  %v6295_v58 = vld [vmem:[#allocation2 + $0xbc0] sm:$0xff]  }
 0x1b1   :  { %5682 = vmatpush3.bf16.msra.mxu0 %v6228_v63  ;;  %v4892_v63 = vcombine.low %v153_v61, %v177_v62 }
 0x1b2   :  { %5704 = vmatpush3.bf16.msra.mxu1 %v6229_v0  ;;  %5711 = vmatprep.subr.bf16.mxu0 %v6230_v9  ;;  %v4893_v0 = vcombine.high %v153_v61, %v177_v62  ;;  %v6270_v9 = vld [vmem:[#allocation2 + $0xa50] sm:$0xff]   ;;  %v6298_v61 = vld [vmem:[#allocation2 + $0xb48] sm:$0xff]  }
 0x1b3   :  { %5733 = vmatprep.subr.bf16.mxu1 %v6231_v10  ;;  %v6271_v10 = vld [vmem:[#allocation2 + $0xad0] sm:$0xff]   ;;  %v6299_v62 = vld [vmem:[#allocation2 + $0xbc8] sm:$0xff]  }
 0x1b4   :  { %4190 = vmatmul.mubr.bf16.vlgmr.msra.gmra.mrb[32].mxu0 %v4886_v4  ;;  %v6265_v4 = vld [vmem:[#allocation2 + $0xa80] sm:$0xff]  }
 0x1b5   :  { %4231 = vmatmul.mubr.bf16.vlgmr.msra.gmra.mrb[32].mxu1 %v4888_v7  ;;  %5712 = vmatpush3.bf16.msra.mxu0 %v6232_v11  ;;  %v6268_v7 = vld [vmem:[#allocation2 + $0xa08] sm:$0xff]   ;;  %v6272_v11 = vld [vmem:[#allocation2 + $0xa10] sm:$0xff]  }
 0x1b6   :  { %5734 = vmatpush3.bf16.msra.mxu1 %v6233_v12  ;;  %5713 = vmatprep.subr.bf16.mxu0 %v6234_v13  ;;  %v6273_v12 = vld [vmem:[#allocation2 + $0xa90] sm:$0xff]   ;;  %v6274_v13 = vld [vmem:[#allocation2 + $0xa58] sm:$0xff]  }
 0x1b7   :  { %5735 = vmatprep.subr.bf16.mxu1 %v6235_v14  ;;  %4271 = vmatprep.mubr.bf16.mxu0 %v4891_v60  ;;  %v6275_v14 = vld [vmem:[#allocation2 + $0xad8] sm:$0xff]   ;;  %v6297_v60 = vld [vmem:[#allocation2 + $0xb80] sm:$0xff]  }
 0x1b8   :  { %4312 = vmatprep.mubr.bf16.mxu1 %v4893_v0  ;;  %v6301_v0 = vld [vmem:[#allocation2 + $0xb88] sm:$0xff]  }
 0x1b9   :  { %5714 = vmatpush3.bf16.msra.mxu0 %v6236_v15 }
 0x1ba   :  { %5736 = vmatpush3.bf16.msra.mxu1 %v6237_v16  ;;  %5715 = vmatprep.subr.bf16.mxu0 %v6238_v17  ;;  %v6276_v16 = vld [vmem:[#allocation2 + $0xa18] sm:$0xff]  }
 0x1bb   :  { %5737 = vmatprep.subr.bf16.mxu1 %v6239_v18  ;;  %v6277_v18 = vld [vmem:[#allocation2 + $0xa98] sm:$0xff]  }
 0x1bd   :  { %5716 = vmatpush3.bf16.msra.mxu0 %v6240_v19 }
 0x1be   :  { %5738 = vmatpush3.bf16.msra.mxu1 %v6241_v20  ;;  %5717 = vmatprep.subr.bf16.mxu0 %v6242_v21  ;;  %v6278_v20 = vld [vmem:[#allocation2 + $0xa60] sm:$0xff]  }
 0x1bf   :  { %5739 = vmatprep.subr.bf16.mxu1 %v6243_v22 }
 0x1c1   :  { %5718 = vmatpush3.bf16.msra.mxu0 %v6244_v24 }
 0x1c2   :  { %5740 = vmatpush3.bf16.msra.mxu1 %v6245_v26  ;;  %5719 = vmatprep.subr.bf16.mxu0 %v6246_v28  ;;  %v6280_v26 = vld [vmem:[#allocation2 + $0xa20] sm:$0xff]  }
 0x1c3   :  { %5741 = vmatprep.subr.bf16.mxu1 %v6247_v31 }
 0x1c5   :  { %5720 = vmatpush3.bf16.msra.mxu0 %v6248_v34 }
 0x1c6   :  { %5742 = vmatpush3.bf16.msra.mxu1 %v6249_v37  ;;  %5721 = vmatprep.subr.bf16.mxu0 %v6250_v40  ;;  %v6284_v37 = vld [vmem:[#allocation2 + $0xa28] sm:$0xff]  }
 0x1c7   :  { %v5419_v23 = vpop.f32.mrb[8].mxu0  ;;  %5743 = vmatprep.subr.bf16.mxu1 %v6251_v43  ;;  %v6285_v40 = vld [vmem:[#allocation2 + $0xaa8] sm:$0xff]   ;;  %v6288_v43 = vld [vmem:[#allocation2 + $0xa30] sm:$0xff]  }
 0x1c8   :  { %v5441_v25 = vpop.f32.mrb[8].mxu1  ;;  %v5420_v27 = vpop.f32.mrb[9].mxu0 }
 0x1c9   :  { %v5421_v29 = vadd.f32 %v5420_v27, %v5419_v23  ;;  %v5442_v30 = vpop.f32.mrb[9].mxu1  ;;  %v5422_v33 = vpop.f32.mrb[10].mxu0  ;;  %5722 = vmatpush3.bf16.msra.mxu0 %v6252_v45  ;;  %v6279_v23 = vld [vmem:[#allocation2 + $0xae0] sm:$0xff]   ;;  %v6290_v45 = vld [vmem:[#allocation2 + $0xa78] sm:$0xff]  }
 0x1ca   :  { %v5443_v32 = vadd.f32 %v5442_v30, %v5441_v25  ;;  %v5444_v36 = vpop.f32.mrb[10].mxu1  ;;  %v5423_v38 = vpop.f32.mrb[11].mxu0  ;;  %5744 = vmatpush3.bf16.msra.mxu1 %v6253_v48  ;;  %5723 = vmatprep.subr.bf16.mxu0 %v6254_v49  ;;  %v6292_v48 = vld [vmem:[#allocation2 + $0xa38] sm:$0xff]   ;;  %v154_v49 = vld [vmem:[%s6932_s0 + $0xa0] sm:$0xff] }
 0x1cb   :  { %v3700_v35 = vadd.f32 %v5421_v29, %v6829_v47  ;;  %v5424_v41 = vadd.f32 %v5423_v38, %v5422_v33  ;;  %v5445_v42 = vpop.f32.mrb[11].mxu1  ;;  %5745 = vmatprep.subr.bf16.mxu1 %v6255_v50  ;;  %v6281_v29 = vld [vmem:[#allocation2 + $0xaa0] sm:$0xff]  }
 0x1cc   :  { %v5446_v44 = vadd.f32 %v5445_v42, %v5444_v36  ;;  %v6287_v42 = vld [vmem:[#allocation2 + $0xaf0] sm:$0xff]   ;;  %v178_v50 = vld [vmem:[%s6932_s0 + $0x160] sm:$0xff] }
 0x1cd   :  { %v6847_v39 = vadd.f32 %v5443_v32, %v3700_v35  ;;  %v3703_v46 = vadd.f32 %v5424_v41, %v6832_v56  ;;  %5724 = vmatpush3.bf16.msra.mxu0 %v6256_v51  ;;  %v6261_v56 = vld [vmem:[#allocation2 + $0x9b8] sm:$0xff]   ;;  %v6282_v32 = vld [vmem:[#allocation2 + $0xa68] sm:$0xff]   ;;  %v6286_v41 = vld [vmem:[#allocation2 + $0xa70] sm:$0xff]  }
 0x1ce   :  { %5746 = vmatpush3.bf16.msra.mxu1 %v6257_v52  ;;  %5725 = vmatprep.subr.bf16.mxu0 %v6258_v53  ;;  %v6283_v35 = vld [vmem:[#allocation2 + $0xae8] sm:$0xff]   ;;  %v4894_v53 = vcombine.low %v154_v49, %v178_v50 }
 0x1cf   :  { %v6850_v47 = vadd.f32 %v5446_v44, %v3703_v46  ;;  %5747 = vmatprep.subr.bf16.mxu1 %v6259_v54  ;;  %v6289_v44 = vld [vmem:[#allocation2 + $0xab0] sm:$0xff]   ;;  %v6291_v46 = vld [vmem:[#allocation2 + $0xaf8] sm:$0xff]   ;;  %v155_v51 = vld [vmem:[%s6932_s0 + $0xa8] sm:$0xff]  ;;  %v4895_v54 = vcombine.high %v154_v49, %v178_v50 }
 0x1d0   :  { %v179_v52 = vld [vmem:[%s6932_s0 + $0x168] sm:$0xff] }
 0x1d1   :  { %5726 = vmatpush3.bf16.msra.mxu0 %v6260_v55  ;;  %v4896_v55 = vcombine.low %v155_v51, %v179_v52 }
 0x1d2   :  { %5748 = vmatpush3.bf16.msra.mxu1 %v6261_v56  ;;  %5755 = vmatprep.subr.bf16.mxu0 %v6262_v1  ;;  %v4897_v56 = vcombine.high %v155_v51, %v179_v52  ;;  %v6302_v1 = vld [vmem:[#allocation2 + $0xb50] sm:$0xff]  }
 0x1d3   :  { %5777 = vmatprep.subr.bf16.mxu1 %v6263_v2  ;;  %v6303_v2 = vld [vmem:[#allocation2 + $0xbd0] sm:$0xff]  }
 0x1d4   :  { %4272 = vmatmul.mubr.bf16.vlgmr.msra.gmra.mrb[36].mxu0 %v4890_v59  ;;  %v6296_v59 = vld [vmem:[#allocation2 + $0xb00] sm:$0xff]  }
 0x1d5   :  { %4313 = vmatmul.mubr.bf16.vlgmr.msra.gmra.mrb[36].mxu1 %v4892_v63  ;;  %5756 = vmatpush3.bf16.msra.mxu0 %v6264_v3  ;;  %v6300_v63 = vld [vmem:[#allocation2 + $0xb08] sm:$0xff]   ;;  %v6304_v3 = vld [vmem:[#allocation2 + $0xb10] sm:$0xff]  }
 0x1d6   :  { %5778 = vmatpush3.bf16.msra.mxu1 %v6265_v4  ;;  %5757 = vmatprep.subr.bf16.mxu0 %v6266_v5  ;;  %v6305_v4 = vld [vmem:[#allocation2 + $0xb90] sm:$0xff]   ;;  %v6306_v5 = vld [vmem:[#allocation2 + $0xb58] sm:$0xff]  }
 0x1d7   :  { %5779 = vmatprep.subr.bf16.mxu1 %v6267_v6  ;;  %4353 = vmatprep.mubr.bf16.mxu0 %v4895_v54  ;;  %v6307_v6 = vld [vmem:[#allocation2 + $0xbd8] sm:$0xff]  }
 0x1d8   :  { %4394 = vmatprep.mubr.bf16.mxu1 %v4897_v56 }
 0x1d9   :  { %5758 = vmatpush3.bf16.msra.mxu0 %v6268_v7 }
 0x1da   :  { %5780 = vmatpush3.bf16.msra.mxu1 %v6269_v8  ;;  %5759 = vmatprep.subr.bf16.mxu0 %v6270_v9  ;;  %v6308_v8 = vld [vmem:[#allocation2 + $0xb18] sm:$0xff]  }
 0x1db   :  { %5781 = vmatprep.subr.bf16.mxu1 %v6271_v10  ;;  %v6309_v10 = vld [vmem:[#allocation2 + $0xb98] sm:$0xff]  }
 0x1dd   :  { %5760 = vmatpush3.bf16.msra.mxu0 %v6272_v11 }
 0x1de   :  { %5782 = vmatpush3.bf16.msra.mxu1 %v6273_v12  ;;  %5761 = vmatprep.subr.bf16.mxu0 %v6274_v13  ;;  %v6310_v12 = vld [vmem:[#allocation2 + $0xb60] sm:$0xff]  }
 0x1df   :  { %5783 = vmatprep.subr.bf16.mxu1 %v6275_v14 }
 0x1e1   :  { %5762 = vmatpush3.bf16.msra.mxu0 %v6276_v16 }
 0x1e2   :  { %5784 = vmatpush3.bf16.msra.mxu1 %v6277_v18  ;;  %5763 = vmatprep.subr.bf16.mxu0 %v6278_v20  ;;  %v6312_v18 = vld [vmem:[#allocation2 + $0xb20] sm:$0xff]  }
 0x1e3   :  { %5785 = vmatprep.subr.bf16.mxu1 %v6279_v23 }
 0x1e5   :  { %5764 = vmatpush3.bf16.msra.mxu0 %v6280_v26 }
 0x1e6   :  { %5786 = vmatpush3.bf16.msra.mxu1 %v6281_v29  ;;  %5765 = vmatprep.subr.bf16.mxu0 %v6282_v32  ;;  %v6316_v29 = vld [vmem:[#allocation2 + $0xb28] sm:$0xff]  }
 0x1e7   :  { %v5463_v15 = vpop.f32.mrb[12].mxu0  ;;  %5787 = vmatprep.subr.bf16.mxu1 %v6283_v35  ;;  %v6317_v32 = vld [vmem:[#allocation2 + $0xba8] sm:$0xff]   ;;  %v6320_v35 = vld [vmem:[#allocation2 + $0xb30] sm:$0xff]  }
 0x1e8   :  { %v5485_v17 = vpop.f32.mrb[12].mxu1  ;;  %v5464_v19 = vpop.f32.mrb[13].mxu0 }
 0x1e9   :  { %v5465_v21 = vadd.f32 %v5464_v19, %v5463_v15  ;;  %v5486_v22 = vpop.f32.mrb[13].mxu1  ;;  %v5466_v25 = vpop.f32.mrb[14].mxu0  ;;  %5766 = vmatpush3.bf16.msra.mxu0 %v6284_v37  ;;  %v6311_v15 = vld [vmem:[#allocation2 + $0xbe0] sm:$0xff]   ;;  %v6322_v37 = vld [vmem:[#allocation2 + $0xb78] sm:$0xff]  }
 0x1ea   :  { %v5487_v24 = vadd.f32 %v5486_v22, %v5485_v17  ;;  %v5488_v28 = vpop.f32.mrb[14].mxu1  ;;  %v5467_v30 = vpop.f32.mrb[15].mxu0  ;;  %5788 = vmatpush3.bf16.msra.mxu1 %v6285_v40  ;;  %5767 = vmatprep.subr.bf16.mxu0 %v6286_v41  ;;  %v6324_v40 = vld [vmem:[#allocation2 + $0xb38] sm:$0xff]  }
 0x1eb   :  { %v3782_v27 = vadd.f32 %v5465_v21, %v6847_v39  ;;  %v5468_v33 = vadd.f32 %v5467_v30, %v5466_v25  ;;  %v5489_v34 = vpop.f32.mrb[15].mxu1  ;;  %5789 = vmatprep.subr.bf16.mxu1 %v6287_v42  ;;  %v6313_v21 = vld [vmem:[#allocation2 + $0xba0] sm:$0xff]   ;;  %v6325_v41 = vld [vmem:[#allocation2 + $0xbb8] sm:$0xff]   ;;  %v180_v42 = vld [vmem:[%s6932_s0 + $0x170] sm:$0xff] }
 0x1ec   :  { %v5490_v36 = vadd.f32 %v5489_v34, %v5488_v28  ;;  %v6319_v34 = vld [vmem:[#allocation2 + $0xbf0] sm:$0xff]  }
 0x1ed   :  { %v6865_v31 = vadd.f32 %v5487_v24, %v3782_v27  ;;  %v3785_v38 = vadd.f32 %v5468_v33, %v6850_v47  ;;  %5768 = vmatpush3.bf16.msra.mxu0 %v6288_v43  ;;  %v6293_v47 = vld [vmem:[#allocation2 + $0xab8] sm:$0xff]   ;;  %v6314_v24 = vld [vmem:[#allocation2 + $0xb68] sm:$0xff]  }
 0x1ee   :  { %5790 = vmatpush3.bf16.msra.mxu1 %v6289_v44  ;;  %5769 = vmatprep.subr.bf16.mxu0 %v6290_v45  ;;  %v6315_v27 = vld [vmem:[#allocation2 + $0xbe8] sm:$0xff]   ;;  %v157_v43 = vld [vmem:[%s6932_s0 + $0xb8] sm:$0xff] }
 0x1ef   :  { %v6868_v39 = vadd.f32 %v5490_v36, %v3785_v38  ;;  %5791 = vmatprep.subr.bf16.mxu1 %v6291_v46  ;;  %v6321_v36 = vld [vmem:[#allocation2 + $0xbb0] sm:$0xff]   ;;  %v6323_v38 = vld [vmem:[#allocation2 + $0xbf8] sm:$0xff]  }
 0x1f0   :  { %v181_v46 = vld [vmem:[%s6932_s0 + $0x178] sm:$0xff] }
 0x1f1   :  { %5770 = vmatpush3.bf16.msra.mxu0 %v6292_v48  ;;  %v4900_v48 = vcombine.low %v157_v43, %v181_v46 }
 0x1f2   :  { %5792 = vmatpush3.bf16.msra.mxu1 %v6293_v47  ;;  %5799 = vmatprep.subr.bf16.mxu0 %v6294_v57  ;;  %v4901_v47 = vcombine.high %v157_v43, %v181_v46  ;;  %v6335_v43 = vld [vmem:[#allocation9 + $0x8] sm:$0xff]  }
 0x1f3   :  { %5821 = vmatprep.subr.bf16.mxu1 %v6295_v58 }
 0x1f4   :  { %4354 = vmatmul.mubr.bf16.vlgmr.msra.gmra.mrb[40].mxu0 %v4894_v53 }
 0x1f5   :  { %4395 = vmatmul.mubr.bf16.vlgmr.msra.gmra.mrb[40].mxu1 %v4896_v55  ;;  %5800 = vmatpush3.bf16.msra.mxu0 %v6296_v59 }
 0x1f6   :  { %5822 = vmatpush3.bf16.msra.mxu1 %v6297_v60  ;;  %5801 = vmatprep.subr.bf16.mxu0 %v6298_v61 }
 0x1f7   :  { %5823 = vmatprep.subr.bf16.mxu1 %v6299_v62  ;;  %4476 = vmatprep.mubr.bf16.mxu1 %v4901_v47 }
 0x1f9   :  { %5802 = vmatpush3.bf16.msra.mxu0 %v6300_v63 }
 0x1fa   :  { %5824 = vmatpush3.bf16.msra.mxu1 %v6301_v0  ;;  %5803 = vmatprep.subr.bf16.mxu0 %v6302_v1 }
 0x1fb   :  { %5825 = vmatprep.subr.bf16.mxu1 %v6303_v2 }
 0x1fd   :  { %5804 = vmatpush3.bf16.msra.mxu0 %v6304_v3 }
 0x1fe   :  { %5826 = vmatpush3.bf16.msra.mxu1 %v6305_v4  ;;  %5805 = vmatprep.subr.bf16.mxu0 %v6306_v5 }
 0x1ff   :  { %5827 = vmatprep.subr.bf16.mxu1 %v6307_v6 }
 0x201   :  { %5806 = vmatpush3.bf16.msra.mxu0 %v6308_v8 }
 0x202   :  { %5828 = vmatpush3.bf16.msra.mxu1 %v6309_v10  ;;  %5807 = vmatprep.subr.bf16.mxu0 %v6310_v12 }
 0x203   :  { %5829 = vmatprep.subr.bf16.mxu1 %v6311_v15 }
 0x205   :  { %5808 = vmatpush3.bf16.msra.mxu0 %v6312_v18  ;;  %v6554_v18 = vmov 0.0  }
 0x206   :  { %5830 = vmatpush3.bf16.msra.mxu1 %v6313_v21  ;;  %5809 = vmatprep.subr.bf16.mxu0 %v6314_v24  ;;  %v6329_v21 = vld [vmem:[#allocation6 + $0x18] sm:$0xff]  }
 0x207   :  { %v5507_v7 = vpop.f32.mrb[16].mxu0  ;;  %5831 = vmatprep.subr.bf16.mxu1 %v6315_v27 }
 0x208   :  { %v5529_v9 = vpop.f32.mrb[16].mxu1  ;;  %v5508_v11 = vpop.f32.mrb[17].mxu0 }
 0x209   :  { %v5509_v13 = vadd.f32 %v5508_v11, %v5507_v7  ;;  %v5530_v14 = vpop.f32.mrb[17].mxu1  ;;  %v5510_v17 = vpop.f32.mrb[18].mxu0  ;;  %5810 = vmatpush3.bf16.msra.mxu0 %v6316_v29 }
 0x20a   :  { %v5531_v16 = vadd.f32 %v5530_v14, %v5529_v9  ;;  %v5532_v20 = vpop.f32.mrb[18].mxu1  ;;  %v5511_v22 = vpop.f32.mrb[19].mxu0  ;;  %5832 = vmatpush3.bf16.msra.mxu1 %v6317_v32 }
 0x20b   :  { %v3864_v19 = vadd.f32 %v5509_v13, %v6865_v31  ;;  %v5512_v25 = vadd.f32 %v5511_v22, %v5510_v17  ;;  %v5533_v26 = vpop.f32.mrb[19].mxu1  ;;  %v6318_v31 = vld [vmem:[#allocation2 + $0xb70] sm:$0xff]   ;;  %5833 = vmatprep.subr.bf16.mxu1 %v6319_v34  ;;  %v6326_v17 = vld [vmem:[#allocation6] sm:$0xff]  }
 0x20c   :  { %v5534_v28 = vadd.f32 %v5533_v26, %v5532_v20  ;;  %5811 = vmatprep.subr.bf16.mxu0 %v6318_v31  ;;  %v6328_v20 = vld [vmem:[#allocation6 + $0x10] sm:$0xff]   ;;  %v6330_v22 = vld [vmem:[#allocation6 + $0x20] sm:$0xff]  }
 0x20d   :  { %v3905_v23 = vadd.f32 %v5531_v16, %v3864_v19  ;;  %v3867_v30 = vadd.f32 %v5512_v25, %v6868_v39  ;;  %5812 = vmatpush3.bf16.msra.mxu0 %v6320_v35  ;;  %v156_v39 = vld [vmem:[%s6932_s0 + $0xb0] sm:$0xff] }
 0x20e   :  { %5834 = vmatpush3.bf16.msra.mxu1 %v6321_v36  ;;  %5813 = vmatprep.subr.bf16.mxu0 %v6322_v37  ;;  %v4898_v44 = vcombine.low %v156_v39, %v180_v42  ;;  %v4899_v45 = vcombine.high %v156_v39, %v180_v42  ;;  %v6327_v19 = vld [vmem:[#allocation6 + $0x8] sm:$0xff]   ;;  %v6333_v39 = vld [vmem:[#allocation6 + $0x38] sm:$0xff]  }
 0x20f   :  { %v3908_v33 = vadd.f32 %v5534_v28, %v3867_v30  ;;  %5835 = vmatprep.subr.bf16.mxu1 %v6323_v38  ;;  %v6331_v38 = vld [vmem:[#allocation6 + $0x28] sm:$0xff]  }
 0x210   :  { %4435 = vmatprep.mubr.bf16.mxu0 %v4899_v45  ;;  %v6334_v42 = vld [vmem:[#allocation9] sm:$0xff]   ;;  %v6337_v45 = vld [vmem:[#allocation9 + $0x18] sm:$0xff]  }
 0x211   :  { %5814 = vmatpush3.bf16.msra.mxu0 %v6324_v40 }
 0x212   :  { %5836 = vmatpush3.bf16.msra.mxu1 %v6325_v41  ;;  %5870 = vmatprep.subr.bf16.mxu0 %v6554_v18  ;;  %v6332_v41 = vld [vmem:[#allocation6 + $0x30] sm:$0xff]  }
 0x213   :  { %5890 = vmatprep.subr.bf16.mxu1 %v6554_v18 }
 0x214   :  { %4436 = vmatmul.mubr.bf16.vlgmr.msra.gmra.mrb[44].mxu0 %v4898_v44  ;;  %v6336_v44 = vld [vmem:[#allocation9 + $0x10] sm:$0xff]  }
 0x215   :  { %4477 = vmatmul.mubr.bf16.vlgmr.msra.gmra.mrb[44].mxu1 %v4900_v48  ;;  %5871 = vmatpush3.bf16.msra.mxu0 %v6326_v17  ;;  %v6338_v48 = vld [vmem:[#allocation9 + $0x20] sm:$0xff]  }
 0x216   :  { %5872 = vmatprep.subr.bf16.mxu0 %v6554_v18  ;;  %5886 = vmatprep.mubr.msk.bf16.mxu0 %vm6555_vm0, %v6554_v18 }
 0x217   :  { %5906 = vmatprep.mubr.msk.bf16.mxu1 %vm6555_vm0, %v6554_v18  ;;  %5891 = vmatpush3.bf16.msra.mxu1 %v6334_v42 }
 0x218   :  { %5892 = vmatprep.subr.bf16.mxu1 %v6554_v18 }
 0x219   :  { %5873 = vmatpush3.bf16.msra.mxu0 %v6327_v19 }
 0x21a   :  { %5874 = vmatprep.subr.bf16.mxu0 %v6554_v18 }
 0x21b   :  { %5893 = vmatpush3.bf16.msra.mxu1 %v6335_v43 }
 0x21c   :  { %5894 = vmatprep.subr.bf16.mxu1 %v6554_v18 }
 0x21d   :  { %5875 = vmatpush3.bf16.msra.mxu0 %v6328_v20 }
 0x21e   :  { %5876 = vmatprep.subr.bf16.mxu0 %v6554_v18 }
 0x21f   :  { %5895 = vmatpush3.bf16.msra.mxu1 %v6336_v44 }
 0x220   :  { %5896 = vmatprep.subr.bf16.mxu1 %v6554_v18 }
 0x221   :  { %5877 = vmatpush3.bf16.msra.mxu0 %v6329_v21 }
 0x222   :  { %5878 = vmatprep.subr.bf16.mxu0 %v6554_v18 }
 0x223   :  { %5897 = vmatpush3.bf16.msra.mxu1 %v6337_v45 }
 0x224   :  { %5898 = vmatprep.subr.bf16.mxu1 %v6554_v18 }
 0x225   :  { %5879 = vmatpush3.bf16.msra.mxu0 %v6330_v22 }
 0x226   :  { %5880 = vmatprep.subr.bf16.mxu0 %v6554_v18 }
 0x227   :  { %v5551_v49 = vpop.f32.mrb[20].mxu0  ;;  %5899 = vmatpush3.bf16.msra.mxu1 %v6338_v48 }
 0x228   :  { %v5573_v50 = vpop.f32.mrb[20].mxu1  ;;  %v5552_v51 = vpop.f32.mrb[21].mxu0  ;;  %5900 = vmatprep.subr.bf16.mxu1 %v6554_v18 }
 0x229   :  { %v5574_v52 = vpop.f32.mrb[21].mxu1  ;;  %v5553_v53 = vadd.f32 %v5552_v51, %v5551_v49  ;;  %v5554_v55 = vpop.f32.mrb[22].mxu0  ;;  %5881 = vmatpush3.bf16.msra.mxu0 %v6331_v38 }
 0x22a   :  { %v5575_v54 = vadd.f32 %v5574_v52, %v5573_v50  ;;  %v5576_v56 = vpop.f32.mrb[22].mxu1  ;;  %v5555_v57 = vpop.f32.mrb[23].mxu0  ;;  %5882 = vmatprep.subr.bf16.mxu0 %v6554_v18 }
 0x22b   :  { %v5577_v58 = vpop.f32.mrb[23].mxu1  ;;  %v3946_v59 = vadd.f32 %v5553_v53, %v3905_v23  ;;  %v5556_v60 = vadd.f32 %v5555_v57, %v5554_v55 }
 0x22c   :  { %v5578_v61 = vadd.f32 %v5577_v58, %v5576_v56 }
 0x22d   :  { %v3987_v62 = vadd.f32 %v5575_v54, %v3946_v59  ;;  %v3949_v63 = vadd.f32 %v5556_v60, %v3908_v33  ;;  %5883 = vmatpush3.bf16.msra.mxu0 %v6332_v41  ;;  %v6339_v59 = vld [vmem:[#allocation9 + $0x28] sm:$0xff]  }
 0x22e   :  { %5884 = vmatprep.subr.bf16.mxu0 %v6554_v18  ;;  %5901 = vmatpush3.bf16.msra.mxu1 %v6339_v59  ;;  %v6347_v59 = vld [vmem:[#allocation12 + $0x28] sm:$0xff]  }
 0x22f   :  { %v3990_v0 = vadd.f32 %v5578_v61, %v3949_v63  ;;  %5902 = vmatprep.subr.bf16.mxu1 %v6554_v18 }
 0x231   :  { %5885 = vmatpush3.bf16.msra.mxu0 %v6333_v39 }
 0x232   :  { %5910 = vmatprep.subr.bf16.mxu0 %v6554_v18 }
 0x247   :  { %v5595_v1 = vpop.f32.mrb[24].mxu0 }
 0x248   :  { %v5617_v2 = vpop.f32.mrb[24].mxu1  ;;  %v5596_v3 = vpop.f32.mrb[25].mxu0 }
 0x249   :  { %v5597_v4 = vadd.f32 %v5596_v3, %v5595_v1  ;;  %v5618_v5 = vpop.f32.mrb[25].mxu1  ;;  %v5598_v6 = vpop.f32.mrb[26].mxu0 }
 0x24a   :  { %v5619_v7 = vadd.f32 %v5618_v5, %v5617_v2  ;;  %v5620_v8 = vpop.f32.mrb[26].mxu1  ;;  %v5599_v9 = vpop.f32.mrb[27].mxu0 }
 0x24b   :  { %v4028_v10 = vadd.f32 %v5597_v4, %v3987_v62  ;;  %v5600_v11 = vadd.f32 %v5599_v9, %v5598_v6  ;;  %v5621_v12 = vpop.f32.mrb[27].mxu1 }
 0x24c   :  { %v5622_v13 = vadd.f32 %v5621_v12, %v5620_v8 }
 0x24d   :  { %v4069_v14 = vadd.f32 %v5619_v7, %v4028_v10  ;;  %v4031_v15 = vadd.f32 %v5600_v11, %v3990_v0 }
 0x24f   :  { %v4072_v16 = vadd.f32 %v5622_v13, %v4031_v15 }
 0x267   :  { %v5639_v23 = vpop.f32.mrb[28].mxu0 }
 0x268   :  { %v5661_v24 = vpop.f32.mrb[28].mxu1  ;;  %v5640_v25 = vpop.f32.mrb[29].mxu0 }
 0x269   :  { %v5662_v26 = vpop.f32.mrb[29].mxu1  ;;  %v5641_v27 = vadd.f32 %v5640_v25, %v5639_v23  ;;  %v5642_v29 = vpop.f32.mrb[30].mxu0 }
 0x26a   :  { %v5663_v28 = vadd.f32 %v5662_v26, %v5661_v24  ;;  %v5664_v30 = vpop.f32.mrb[30].mxu1  ;;  %v5643_v32 = vpop.f32.mrb[31].mxu0 }
 0x26b   :  { %v5665_v33 = vpop.f32.mrb[31].mxu1  ;;  %v4110_v31 = vadd.f32 %v5641_v27, %v4069_v14  ;;  %v5644_v34 = vadd.f32 %v5643_v32, %v5642_v29 }
 0x26c   :  { %v5666_v35 = vadd.f32 %v5665_v33, %v5664_v30 }
 0x26d   :  { %v4151_v36 = vadd.f32 %v5663_v28, %v4110_v31  ;;  %v4113_v37 = vadd.f32 %v5644_v34, %v4072_v16 }
 0x26f   :  { %v4154_v40 = vadd.f32 %v5666_v35, %v4113_v37 }
 0x287   :  { %v5683_v46 = vpop.f32.mrb[32].mxu0 }
 0x288   :  { %v5705_v47 = vpop.f32.mrb[32].mxu1  ;;  %v5684_v49 = vpop.f32.mrb[33].mxu0 }
 0x289   :  { %v5685_v50 = vadd.f32 %v5684_v49, %v5683_v46  ;;  %v5706_v51 = vpop.f32.mrb[33].mxu1  ;;  %v5686_v52 = vpop.f32.mrb[34].mxu0 }
 0x28a   :  { %v5707_v53 = vadd.f32 %v5706_v51, %v5705_v47  ;;  %v5708_v54 = vpop.f32.mrb[34].mxu1  ;;  %v5687_v55 = vpop.f32.mrb[35].mxu0 }
 0x28b   :  { %v4192_v56 = vadd.f32 %v5685_v50, %v4151_v36  ;;  %v5688_v57 = vadd.f32 %v5687_v55, %v5686_v52  ;;  %v5709_v58 = vpop.f32.mrb[35].mxu1  ;;  %v6340_v52 = vld [vmem:[#allocation9 + $0x30] sm:$0xff]  }
 0x28c   :  { %v5710_v60 = vadd.f32 %v5709_v58, %v5708_v54  ;;  %5903 = vmatpush3.bf16.msra.mxu1 %v6340_v52  ;;  %v6342_v54 = vld [vmem:[#allocation12] sm:$0xff]   ;;  %v6343_v55 = vld [vmem:[#allocation12 + $0x8] sm:$0xff]  }
 0x28d   :  { %v4233_v61 = vadd.f32 %v5707_v53, %v4192_v56  ;;  %v4195_v62 = vadd.f32 %v5688_v57, %v4154_v40  ;;  %5904 = vmatprep.subr.bf16.mxu1 %v6554_v18  ;;  %v6341_v53 = vld [vmem:[#allocation9 + $0x38] sm:$0xff]   ;;  %v6346_v58 = vld [vmem:[#allocation12 + $0x20] sm:$0xff]  }
 0x28e   :  { %v6344_v56 = vld [vmem:[#allocation12 + $0x10] sm:$0xff]   ;;  %v6345_v57 = vld [vmem:[#allocation12 + $0x18] sm:$0xff]  }
 0x28f   :  { %v4236_v63 = vadd.f32 %v5710_v60, %v4195_v62  ;;  %v5286_v60 = vld [vmem:[#allocation7] ss:$0 sm:$0xff] }
 0x290   :  { %5905 = vmatpush3.bf16.msra.mxu1 %v6341_v53 }
 0x2a7   :  { %v5727_v0 = vpop.f32.mrb[36].mxu0 }
 0x2a8   :  { %v5749_v1 = vpop.f32.mrb[36].mxu1  ;;  %v5728_v2 = vpop.f32.mrb[37].mxu0 }
 0x2a9   :  { %v5729_v3 = vadd.f32 %v5728_v2, %v5727_v0  ;;  %v5750_v4 = vpop.f32.mrb[37].mxu1  ;;  %v5730_v5 = vpop.f32.mrb[38].mxu0 }
 0x2aa   :  { %v5751_v6 = vadd.f32 %v5750_v4, %v5749_v1  ;;  %v5752_v7 = vpop.f32.mrb[38].mxu1  ;;  %v5731_v8 = vpop.f32.mrb[39].mxu0 }
 0x2ab   :  { %v4274_v9 = vadd.f32 %v5729_v3, %v4233_v61  ;;  %v5732_v10 = vadd.f32 %v5731_v8, %v5730_v5  ;;  %v5753_v11 = vpop.f32.mrb[39].mxu1  ;;  %v5295_v8 = vld [vmem:[#allocation10] ss:$0 sm:$0xff] }
 0x2ac   :  { %v5754_v12 = vadd.f32 %v5753_v11, %v5752_v7  ;;  %v6349_v7 = vld [vmem:[#allocation12 + $0x38] sm:$0xff]  }
 0x2ad   :  { %v4315_v13 = vadd.f32 %v5751_v6, %v4274_v9  ;;  %v4277_v14 = vadd.f32 %v5732_v10, %v4236_v63  ;;  %v6348_v6 = vld [vmem:[#allocation12 + $0x30] sm:$0xff]  }
 0x2af   :  { %v4318_v15 = vadd.f32 %v5754_v12, %v4277_v14 }
 0x2c7   :  { %v5771_v16 = vpop.f32.mrb[40].mxu0 }
 0x2c8   :  { %v5793_v17 = vpop.f32.mrb[40].mxu1  ;;  %v5772_v19 = vpop.f32.mrb[41].mxu0 }
 0x2c9   :  { %v5794_v20 = vpop.f32.mrb[41].mxu1  ;;  %v5773_v21 = vadd.f32 %v5772_v19, %v5771_v16  ;;  %v5774_v23 = vpop.f32.mrb[42].mxu0  ;;  %v5304_v19 = vld [vmem:[#allocation13] ss:$0 sm:$0xff] }
 0x2ca   :  { %v5795_v22 = vadd.f32 %v5794_v20, %v5793_v17  ;;  %v5796_v24 = vpop.f32.mrb[42].mxu1  ;;  %v5775_v25 = vpop.f32.mrb[43].mxu0 }
 0x2cb   :  { %v5797_v26 = vpop.f32.mrb[43].mxu1  ;;  %v4356_v27 = vadd.f32 %v5773_v21, %v4315_v13  ;;  %v5776_v28 = vadd.f32 %v5775_v25, %v5774_v23 }
 0x2cc   :  { %v5798_v29 = vadd.f32 %v5797_v26, %v5796_v24 }
 0x2cd   :  { %v4397_v30 = vadd.f32 %v5795_v22, %v4356_v27  ;;  %v4359_v32 = vadd.f32 %v5776_v28, %v4318_v15 }
 0x2cf   :  { %v4400_v33 = vadd.f32 %v5798_v29, %v4359_v32 }
 0x2e7   :  { %v5815_v31 = vpop.f32.mrb[44].mxu0 }
 0x2e8   :  { %v5837_v34 = vpop.f32.mrb[44].mxu1  ;;  %v5816_v35 = vpop.f32.mrb[45].mxu0 }
 0x2e9   :  { %v5817_v36 = vadd.f32 %v5816_v35, %v5815_v31  ;;  %v5838_v37 = vpop.f32.mrb[45].mxu1  ;;  %v5818_v38 = vpop.f32.mrb[46].mxu0 }
 0x2ea   :  { %v5839_v40 = vadd.f32 %v5838_v37, %v5837_v34  ;;  %v5840_v41 = vpop.f32.mrb[46].mxu1  ;;  %v5819_v39 = vpop.f32.mrb[47].mxu0 }
 0x2eb   :  { %v4438_v42 = vadd.f32 %v5817_v36, %v4397_v30  ;;  %v5820_v43 = vadd.f32 %v5819_v39, %v5818_v38  ;;  %v5841_v44 = vpop.f32.mrb[47].mxu1 }
 0x2ec   :  { %v5842_v45 = vadd.f32 %v5841_v44, %v5840_v41 }
 0x2ed   :  { %v4479_v46 = vadd.f32 %v5839_v40, %v4438_v42  ;;  %v4441_v48 = vadd.f32 %v5820_v43, %v4400_v33 }
 0x2ef   :  { %v4482_v47 = vadd.f32 %v5842_v45, %v4441_v48  ;;  %v4485_v49 = vmax.f32 %v4479_v46, 0.0 }
 0x2f1   :  { %v4486_v50 = vmax.f32 %v4482_v47, 0.0 }
 0x2f3   :  { %v4487_v51 = vpack.c.bf16 %v4486_v50, %v4485_v49 }
 0x2f5   :  { %5887 = vmatmul.mubr.bf16.vlgmr.msra.gmra.mrb[48].mxu0 %v4487_v51 }
 0x2f6   :  { %5926 = vmatprep.mubr.msk.bf16.mxu0 %vm6555_vm0, %v6554_v18  ;;  %5911 = vmatpush3.bf16.msra.mxu0 %v6342_v54 }
 0x2f7   :  { %5912 = vmatprep.subr.bf16.mxu0 %v6554_v18 }
 0x2fa   :  { %5913 = vmatpush3.bf16.msra.mxu0 %v6343_v55 }
 0x2fb   :  { %5914 = vmatprep.subr.bf16.mxu0 %v6554_v18 }
 0x2fe   :  { %5915 = vmatpush3.bf16.msra.mxu0 %v6344_v56 }
 0x2ff   :  { %5916 = vmatprep.subr.bf16.mxu0 %v6554_v18 }
 0x302   :  { %5917 = vmatpush3.bf16.msra.mxu0 %v6345_v57 }
 0x303   :  { %5918 = vmatprep.subr.bf16.mxu0 %v6554_v18 }
 0x306   :  { %5919 = vmatpush3.bf16.msra.mxu0 %v6346_v58 }
 0x307   :  { %5920 = vmatprep.subr.bf16.mxu0 %v6554_v18 }
 0x30a   :  { %5921 = vmatpush3.bf16.msra.mxu0 %v6347_v59 }
 0x30b   :  { %5922 = vmatprep.subr.bf16.mxu0 %v6554_v18 }
 0x30e   :  { %5923 = vmatpush3.bf16.msra.mxu0 %v6348_v6 }
 0x30f   :  { %5924 = vmatprep.subr.bf16.mxu0 %v6554_v18 }
 0x312   :  { %5925 = vmatpush3.bf16.msra.mxu0 %v6349_v7 }
 0x3c8   :  { %v4593_v61 = vpop.f32.mrb[48].mxu0 }
 0x3c9   :  { %v4594_v62 = vadd.f32 %v5286_v60, %v4593_v61  ;;  %v5888_v63 = vpop.f32.mrb[49].mxu0 }
 0x3ca   :  { %v4596_v0 = vpop.f32.mrb[50].mxu0 }
 0x3cb   :  { %v4597_v1 = vadd.f32 %v5286_v60, %v4596_v0  ;;  %v5889_v2 = vpop.f32.mrb[51].mxu0  ;;  %v4600_v3 = vmax.f32 %v4594_v62, 0.0 }
 0x3cd   :  { %v4601_v4 = vmax.f32 %v4597_v1, 0.0 }
 0x3cf   :  { %v4602_v5 = vpack.c.bf16 %v4601_v4, %v4600_v3 }
 0x3d1   :  { %5907 = vmatmul.mubr.bf16.vlgmr.msra.gmra.mrb[48].mxu1 %v4602_v5 }
 0x4a4   :  { %v4708_v9 = vpop.f32.mrb[48].mxu1 }
 0x4a5   :  { %v4709_v10 = vadd.f32 %v5295_v8, %v4708_v9  ;;  %v5908_v11 = vpop.f32.mrb[49].mxu1 }
 0x4a6   :  { %v4711_v12 = vpop.f32.mrb[50].mxu1 }
 0x4a7   :  { %v4712_v13 = vadd.f32 %v5295_v8, %v4711_v12  ;;  %v5909_v14 = vpop.f32.mrb[51].mxu1  ;;  %v4715_v15 = vmax.f32 %v4709_v10, 0.0 }
 0x4a9   :  { %v4716_v16 = vmax.f32 %v4712_v13, 0.0 }
 0x4ab   :  { %v4717_v17 = vpack.c.bf16 %v4716_v16, %v4715_v15 }
 0x4ad   :  { %5927 = vmatmul.mubr.bf16.vlgmr.msra.gmra.mrb[52].mxu0 %v4717_v17 }
 0x580   :  { %v4823_v20 = vpop.f32.mrb[52].mxu0 }
 0x581   :  { %v4824_v21 = vadd.f32 %v5304_v19, %v4823_v20  ;;  %v5928_v22 = vpop.f32.mrb[53].mxu0 }
 0x582   :  { %v4826_v23 = vpop.f32.mrb[54].mxu0 }
 0x583   :  { %v5313_v24 = vmul.f32 -1.442695, %v4824_v21  ;;  %v4827_v18 = vadd.f32 %v5304_v19, %v4826_v23  ;;  %v5929_v25 = vpop.f32.mrb[55].mxu0 }
 0x585   :  { %6350 = vpow2.f32 %v5313_v24  ;;  %v5314_v26 = vmul.f32 -1.442695, %v4827_v18 }
 0x587   :  { %6352 = vpow2.f32 %v5314_v26 }
 0x58f   :  { %v6351_v27 = vpop.eup %6350 }
 0x590   :  { %v4836_v28 = vadd.f32 1.0, %v6351_v27 }
 0x591   :  { %v6353_v29 = vpop.eup %6352 }
 0x592   :  { %6354 = vrcp.f32 %v4836_v28  ;;  %v4837_v30 = vadd.f32 1.0, %v6353_v29 }
 0x594   :  { %6356 = vrcp.f32 %v4837_v30 }
 0x59c   :  { %v6355_v32 = vpop.eup %6354 }
 0x59d   :  { %4842 = vst [vmem:[%s6941_s9] sm:$0xff] %v6355_v32 }
 0x59e   :  { %v6357_v33 = vpop.eup %6356 }
 0x59f   :  { %4843 = vst [vmem:[%s6941_s9 + $0x8] sm:$0xff] %v6357_v33 }
 0x5a0   :  { %4848 = vsyncpa [#allocation3], 1 }
 0x5a1   :  { %4849 = vsyncpa [#allocation5], 1 }
 0x5a2   :  { %4850 = vsyncpa [#allocation8], 1 }
 0x5a3   :  { %4851 = vsyncpa [#allocation11], 1 }
 0x5a4   :  { %4852 = vsyncpa [#allocation14], 1 }

</bundles_post_ra>
